<compile_context>
chip_gen: v5e
topology: v5e:2x2
jax: 0.10.0
libtpu: 0.0.40
codegen_flags: <defaults>
</compile_context>

<pallas_src>
import math
import functools

import jax
import jax.numpy as jnp
from jax.experimental import pallas as pl
from jax.experimental.pallas import tpu as pltpu


def _round_up(v, m):
    return (v + m - 1) // m * m


def _divisor_tiles(requested, total):
    """Descending multiples of 128 that divide `total`, starting at
    min(round_up(requested, 128), total).  `total` must be a multiple of 128."""
    t = min(_round_up(max(int(requested), 128), 128), total)
    return [c for c in range(t, 0, -128) if total % c == 0]


def _vmem_capacity_bytes():
    try:
        return int(pltpu.get_tpu_info().vmem_capacity_bytes)
    except Exception:  # non-TPU backend / older jax: assume smallest (v7x per-TC)
        return 64 << 20


# ----------------------------------------------------------------------------
# Kernels
# ----------------------------------------------------------------------------
def _gcnii_kernel_resident(adj_ref, x_ref, h0_ref, w_ref, *rest,
                           theta, alpha, residual):
    # adj_ref: [tn, Np]  row slab of adjacency
    # x_ref:   [Np, Dp]  full node features, VMEM-resident across the grid
    # h0_ref:  [tn, Dp]  row tile of initial embedding
    # w_ref:   [Dp, Dp]  full weight, VMEM-resident
    # rest:    (xres_ref,) out_ref
    if residual:
        xres_ref, out_ref = rest
    else:
        (out_ref,) = rest
        xres_ref = None

    hi = jnp.dot(adj_ref[...], x_ref[...], preferred_element_type=jnp.float32)
    support = (1.0 - alpha) * hi + alpha * h0_ref[...].astype(jnp.float32)
    sw = jnp.dot(support.astype(w_ref.dtype), w_ref[...],
                 preferred_element_type=jnp.float32)
    out = theta * sw + (1.0 - theta) * support
    if residual:
        out = out + xres_ref[...].astype(jnp.float32)
    out_ref[...] = out.astype(out_ref.dtype)


def _gcnii_kernel_ktiled(adj_ref, x_ref, h0_ref, w_ref, *rest,
                         theta, alpha, residual):
    # adj_ref: [tn, tk]   row/col tile of adjacency
    # x_ref:   [tk, Dp]   K-chunk of node features
    # h0_ref:  [tn, Dp]   row tile of initial embedding (used only on finalize)
    # w_ref:   [Dp, Dp]   full weight (resident; used only on finalize)
    # rest:    (xres_ref,) out_ref, acc_ref
    if residual:
        xres_ref, out_ref, acc_ref = rest
    else:
        out_ref, acc_ref = rest
        xres_ref = None

    k = pl.program_id(1)

    @pl.when(k == 0)
    def _init():
        acc_ref[...] = jnp.zeros_like(acc_ref)

    # K-tiled hi = adj @ x on the MXU, f32 accumulation.
    acc_ref[...] += jnp.dot(adj_ref[...], x_ref[...],
                            preferred_element_type=jnp.float32)

    @pl.when(k == pl.num_programs(1) - 1)
    def _finalize():
        hi = acc_ref[...]
        support = (1.0 - alpha) * hi + alpha * h0_ref[...].astype(jnp.float32)
        sw = jnp.dot(support.astype(w_ref.dtype), w_ref[...],
                     preferred_element_type=jnp.float32)
        out = theta * sw + (1.0 - theta) * support
        if residual:
            out = out + xres_ref[...].astype(jnp.float32)
        out_ref[...] = out.astype(out_ref.dtype)


# ----------------------------------------------------------------------------
# Wrappers
# ----------------------------------------------------------------------------
def prepare_adjacency(adj, mxu_dtype=jnp.bfloat16):
    """Cast + pad the adjacency ONCE (hoisted out of the per-layer call).

    A GCNII stack applies many layers to the same adjacency; doing the O(N^2)
    cast/pad here removes 1-2 extra full HBM passes over adj per layer.
    """
    N = adj.shape[0]
    assert adj.shape == (N, N)
    adj_p = adj
    if mxu_dtype is not None and jnp.dtype(mxu_dtype) != adj_p.dtype:
        adj_p = adj_p.astype(mxu_dtype)       # cast first: pads fewer bytes
    Np = _round_up(N, 128)
    if Np != N:
        adj_p = jnp.pad(adj_p, ((0, Np - N), (0, Np - N)))
    return adj_p


def gcnii_forward(x, adj, h0, W, lamda, alpha, l, *,
                  residual=False,
                  tile_n=512, tile_k=2048,
                  mxu_dtype=jnp.bfloat16,
                  prepared_adj=None,
                  force_k_tiled=False):
    """Pallas implementation of GraphConvolutionNetworkII.forward (dense adj).

    mxu_dtype: dtype of the MXU operands (adj/x/W); bf16 by default.  The
        accumulation and theta/alpha blend stay f32.  Use jnp.float32 for a
        bit-accurate f32 run.
    prepared_adj: output of prepare_adjacency(adj, mxu_dtype) to reuse the
        padded/cast adjacency across layers.
    """
    N, D = x.shape
    assert h0.shape == (N, D) and W.shape == (D, D)
    theta = math.log(lamda / l + 1.0)
    out_dtype = x.dtype
    mxu_dtype = jnp.dtype(out_dtype if mxu_dtype is None else mxu_dtype)

    Np = _round_up(N, 128)
    Dp = _round_up(D, 128)

    # --- adjacency: use the pre-padded/cast version if provided -------------
    if prepared_adj is not None:
        adj_mxu = prepared_adj
        if adj_mxu.shape != (Np, Np):
            raise ValueError(
                f"prepared_adj has shape {adj_mxu.shape}, expected {(Np, Np)}")
        if adj_mxu.dtype != mxu_dtype:
            adj_mxu = adj_mxu.astype(mxu_dtype)
    else:
        assert adj.shape == (N, N)
        adj_mxu = prepare_adjacency(adj, mxu_dtype)

    # --- pad the O(N*D)/O(D^2) operands (cheap relative to adj) -------------
    if (Np, Dp) != (N, D):
        x_p = jnp.pad(x, ((0, Np - N), (0, Dp - D)))
        h0_p = jnp.pad(h0, ((0, Np - N), (0, Dp - D)))
        W_p = jnp.pad(W, ((0, Dp - D), (0, Dp - D)))
    else:
        x_p, h0_p, W_p = x, h0, W
    x_mxu = x_p if x_p.dtype == mxu_dtype else x_p.astype(mxu_dtype)
    W_mxu = W_p if W_p.dtype == mxu_dtype else W_p.astype(mxu_dtype)

    bpe_mxu = mxu_dtype.itemsize
    bpe_h0 = jnp.dtype(h0_p.dtype).itemsize
    bpe_x = jnp.dtype(x_p.dtype).itemsize
    bpe_out = jnp.dtype(out_dtype).itemsize

    # --- generation-aware VMEM budget (128 MiB v5e/v6e, 64 MiB/TC v7x) ------
    vmem_cap = _vmem_capacity_bytes()
    budget = int(0.80 * vmem_cap)        # headroom for compiler scratch

    tn_req = int(tile_n)
    if Np >= 256:
        tn_req = min(tn_req, Np // 2)    # >= 2 row tiles keeps both v7x TCs busy

    x_resident_bytes = Np * Dp * bpe_mxu
    w_bytes = Dp * Dp * bpe_mxu

    def _est_resident(cand_n):
        b = x_resident_bytes + w_bytes              # single-buffered (const idx)
        b += 2 * cand_n * Np * bpe_mxu              # adj row slab (double-buf)
        b += 2 * cand_n * Dp * (bpe_h0 + bpe_out)   # h0 tile + out tile
        if residual:
            b += 2 * cand_n * Dp * bpe_x
        return b

    def _est_ktiled(cand_n, cand_k):
        b = 2 * (cand_n * cand_k + cand_k * Dp) * bpe_mxu   # adj + x chunks
        b += w_bytes
        b += 2 * cand_n * Dp * (bpe_h0 + bpe_out)
        if residual:
            b += 2 * cand_n * Dp * bpe_x
        b += cand_n * Dp * 4                                # f32 accumulator
        return b

    variant = None
    tn = tk = None
    vmem_est = 0
    if not force_k_tiled and x_resident_bytes <= budget // 4:
        for cand_n in _divisor_tiles(tn_req, Np):
            est = _est_resident(cand_n)
            if est <= budget:
                variant, tn, vmem_est = "resident", cand_n, est
                break
    if variant is None:
        for cand_n in _divisor_tiles(tn_req, Np):
            for cand_k in _divisor_tiles(tile_k, Np):
                est = _est_ktiled(cand_n, cand_k)
                if est <= budget:
                    variant, tn, tk, vmem_est = "ktiled", cand_n, cand_k, est
                    break
            if variant is not None:
                break
    if variant is None:
        raise ValueError("no tile configuration fits the VMEM budget")

    vmem_limit = min(max(int(vmem_est * 1.3) + (4 << 20), 32 << 20),
                     int(0.95 * vmem_cap))

    # --- advisory cost estimate so XLA schedules surrounding ops well -------
    x_reads = 1 if variant == "resident" else Np // tn
    flops = 2 * Np * Np * Dp + 2 * Np * Dp * Dp
    bytes_accessed = (Np * Np * bpe_mxu + x_reads * Np * Dp * bpe_mxu
                      + Np * Dp * bpe_h0 + Dp * Dp * bpe_mxu
                      + Np * Dp * bpe_out
                      + (Np * Dp * bpe_x if residual else 0))
    cost = pl.CostEstimate(flops=flops, transcendentals=0,
                           bytes_accessed=bytes_accessed)

    def _build_and_call(single_buffer_const):
        # Constant-index blocks (resident x, W) gain nothing from double
        # buffering; requesting a single buffer frees VMEM at zero perf cost.
        const_kw = {"pipeline_mode": pl.Buffered(1)} if single_buffer_const else {}

        if variant == "resident":
            kernel = functools.partial(_gcnii_kernel_resident,
                                       theta=float(theta), alpha=float(alpha),
                                       residual=bool(residual))
            in_specs = [
                pl.BlockSpec((tn, Np), lambda i: (i, 0)),              # adj slab
                pl.BlockSpec((Np, Dp), lambda i: (0, 0), **const_kw),  # x resident
                pl.BlockSpec((tn, Dp), lambda i: (i, 0)),              # h0 tile
                pl.BlockSpec((Dp, Dp), lambda i: (0, 0), **const_kw),  # W resident
            ]
            inputs = [adj_mxu, x_mxu, h0_p, W_mxu]
            if residual:
                in_specs.append(pl.BlockSpec((tn, Dp), lambda i: (i, 0)))
                inputs.append(x_p)
            grid = (Np // tn,)
            out_specs = pl.BlockSpec((tn, Dp), lambda i: (i, 0))
            scratch = []
            dims = ("parallel",)
        else:
            kernel = functools.partial(_gcnii_kernel_ktiled,
                                       theta=float(theta), alpha=float(alpha),
                                       residual=bool(residual))
            in_specs = [
                pl.BlockSpec((tn, tk), lambda i, k: (i, k)),              # adj tile
                pl.BlockSpec((tk, Dp), lambda i, k: (k, 0)),              # x K-chunk
                pl.BlockSpec((tn, Dp), lambda i, k: (i, 0)),              # h0 tile
                pl.BlockSpec((Dp, Dp), lambda i, k: (0, 0), **const_kw),  # W resident
            ]
            inputs = [adj_mxu, x_mxu, h0_p, W_mxu]
            if residual:
                in_specs.append(pl.BlockSpec((tn, Dp), lambda i, k: (i, 0)))
                inputs.append(x_p)
            grid = (Np // tn, Np // tk)
            out_specs = pl.BlockSpec((tn, Dp), lambda i, k: (i, 0))
            scratch = [pltpu.VMEM((tn, Dp), jnp.float32)]
            dims = ("parallel", "arbitrary")

        return pl.pallas_call(
            kernel,
            out_shape=jax.ShapeDtypeStruct((Np, Dp), out_dtype),
            grid_spec=pltpu.PrefetchScalarGridSpec(
                num_scalar_prefetch=0,
                grid=grid,
                in_specs=in_specs,
                out_specs=out_specs,
                scratch_shapes=scratch,
            ),
            compiler_params=pltpu.CompilerParams(
                dimension_semantics=dims,
                vmem_limit_bytes=vmem_limit,
            ),
            cost_estimate=cost,
        )(*inputs)

    try:
        out_p = _build_and_call(single_buffer_const=True)
    except Exception:
        # pl.Buffered(1) / pipeline_mode unsupported on this jax version ->
        # fall back to default double buffering of the constant blocks.
        out_p = _build_and_call(single_buffer_const=False)

    if (Np, Dp) != (N, D):
        out_p = out_p[:N, :D]
    return out_p


# ----------------------------------------------------------------------------
# Reference + tests
# ----------------------------------------------------------------------------
def _reference(x, adj, h0, W, lamda, alpha, l, residual=False):
    theta = math.log(lamda / l + 1.0)
    hp = jax.lax.Precision.HIGHEST
    hi = jnp.matmul(adj, x, precision=hp)
    support = (1.0 - alpha) * hi + alpha * h0
    out = theta * jnp.matmul(support, W, precision=hp) + (1.0 - theta) * support
    if residual:
        out = out + x
    return out


def _make_inputs(key, N, D):
    k1, k2, k3, k4 = jax.random.split(key, 4)
    x = jax.random.normal(k1, (N, D), dtype=jnp.float32)
    h0 = jax.random.normal(k2, (N, D), dtype=jnp.float32)
    a = jax.random.uniform(k3, (N, N), dtype=jnp.float32)
    adj = (a + a.T) * 0.5
    adj = adj / jnp.sum(adj, axis=1, keepdims=True)
    stdv = 1.0 / math.sqrt(D)
    W = jax.random.uniform(k4, (D, D), dtype=jnp.float32, minval=-stdv, maxval=stdv)
    return x, adj, h0, W


if __name__ == "__main__":
    key = jax.random.PRNGKey(0)
    lamda, alpha = 0.5, 0.1

    # --- strict f32 path (resident-x variant), lane-dense sizes -------------
    N, D = 256, 128
    x, adj, h0, W = _make_inputs(key, N, D)
    # Pad/cast the adjacency ONCE and reuse across "layers" (l = 1, 2).
    adj_prep = prepare_adjacency(adj, mxu_dtype=jnp.float32)

    out = jax.block_until_ready(
        gcnii_forward(x, adj, h0, W, lamda, alpha, 1, residual=False,
                      mxu_dtype=jnp.float32, prepared_adj=adj_prep))
    ref = _reference(x, adj, h0, W, lamda, alpha, 1, residual=False)
    assert out.shape == (N, D) and out.dtype == x.dtype
    assert jnp.allclose(out, ref, atol=1e-4, rtol=1e-4)

    out_res = jax.block_until_ready(
        gcnii_forward(x, adj, h0, W, lamda, alpha, 2, residual=True,
                      mxu_dtype=jnp.float32, prepared_adj=adj_prep))
    ref_res = _reference(x, adj, h0, W, lamda, alpha, 2, residual=True)
    assert jnp.allclose(out_res, ref_res, atol=1e-4, rtol=1e-4)

    # --- padding path (N, D not multiples of 128) ---------------------------
    N2, D2 = 200, 96
    x2, adj2, h02, W2 = _make_inputs(jax.random.PRNGKey(1), N2, D2)
    out2 = jax.block_until_ready(
        gcnii_forward(x2, adj2, h02, W2, lamda, alpha, 2, residual=True,
                      mxu_dtype=jnp.float32))
    ref2 = _reference(x2, adj2, h02, W2, lamda, alpha, 2, residual=True)
    assert out2.shape == (N2, D2)
    assert jnp.allclose(out2, ref2, atol=1e-4, rtol=1e-4)

    # --- default bf16-MXU path (f32 accumulation), looser tolerance ---------
    out_bf16 = jax.block_until_ready(
        gcnii_forward(x, adj, h0, W, lamda, alpha, 1, residual=False))
    assert jnp.allclose(out_bf16, ref, atol=5e-2, rtol=5e-2)

    # --- force the K-tiled (accumulator) variant to cover that path ---------
    out_kt = jax.block_until_ready(
        gcnii_forward(x, adj, h0, W, lamda, alpha, 2, residual=True,
                      mxu_dtype=jnp.float32, tile_n=128, tile_k=128,
                      force_k_tiled=True))
    assert jnp.allclose(out_kt, ref_res, atol=1e-4, rtol=1e-4)

    print("KERNEL_OK")
</pallas_src>

<mosaic_0001>
module attributes {stable_mosaic.version = 11 : i64} {
  func.func @_gcnii_kernel_resident(%arg0: i32, %arg1: memref<128x256xf32, #tpu.memory_space<vmem>>, %arg2: memref<256x128xf32, #tpu.memory_space<vmem>>, %arg3: memref<128x128xf32, #tpu.memory_space<vmem>>, %arg4: memref<128x128xf32, #tpu.memory_space<vmem>>, %arg5: memref<128x128xf32, #tpu.memory_space<vmem>>) attributes {dimension_semantics = [#tpu.dimension_semantics<parallel>], iteration_bounds = array<i64: 2>, scalar_prefetch = 0 : i64, scratch_operands = 0 : i64, tpu.core_type = #tpu.core_type<tc>, window_params = [{transform_indices = @transform_0, window_bounds = array<i64: 128, 256>}, {pipeline_mode = #tpu.pipeline_mode<synchronous>, transform_indices = @transform_1, window_bounds = array<i64: 256, 128>}, {transform_indices = @transform_2, window_bounds = array<i64: 128, 128>}, {pipeline_mode = #tpu.pipeline_mode<synchronous>, transform_indices = @transform_3, window_bounds = array<i64: 128, 128>}, {transform_indices = @transform_4, window_bounds = array<i64: 128, 128>}]} {
    %c0 = arith.constant 0 : index
    %c0_0 = arith.constant 0 : index
    %0 = vector.load %arg1[%c0, %c0_0] : memref<128x256xf32, #tpu.memory_space<vmem>>, vector<128x256xf32>
    %c0_1 = arith.constant 0 : index
    %c0_2 = arith.constant 0 : index
    %1 = vector.load %arg2[%c0_1, %c0_2] : memref<256x128xf32, #tpu.memory_space<vmem>>, vector<256x128xf32>
    %cst = arith.constant dense<0.000000e+00> : vector<128x128xf32>
    %2 = tpu.matmul %0, %1, %cst {dimension_numbers = #tpu.dot_dimension_numbers<[1], [0], [0], [1], [0, 0, 1, 1], [], []>} : vector<128x256xf32>, vector<256x128xf32>, vector<128x128xf32> -> vector<128x128xf32>
    %cst_3 = arith.constant 0.899999976 : f32
    %3 = vector.broadcast %cst_3 : f32 to vector<128x128xf32>
    %4 = arith.mulf %3, %2 : vector<128x128xf32>
    %c0_4 = arith.constant 0 : index
    %c0_5 = arith.constant 0 : index
    %5 = vector.load %arg3[%c0_4, %c0_5] : memref<128x128xf32, #tpu.memory_space<vmem>>, vector<128x128xf32>
    %cst_6 = arith.constant 1.000000e-01 : f32
    %6 = vector.broadcast %cst_6 : f32 to vector<128x128xf32>
    %7 = arith.mulf %6, %5 : vector<128x128xf32>
    %8 = arith.addf %4, %7 : vector<128x128xf32>
    %c0_7 = arith.constant 0 : index
    %c0_8 = arith.constant 0 : index
    %9 = vector.load %arg4[%c0_7, %c0_8] : memref<128x128xf32, #tpu.memory_space<vmem>>, vector<128x128xf32>
    %cst_9 = arith.constant dense<0.000000e+00> : vector<128x128xf32>
    %10 = tpu.matmul %8, %9, %cst_9 {dimension_numbers = #tpu.dot_dimension_numbers<[1], [0], [0], [1], [0, 0, 1, 1], [], []>} : vector<128x128xf32>, vector<128x128xf32>, vector<128x128xf32> -> vector<128x128xf32>
    %cst_10 = arith.constant 0.405465096 : f32
    %11 = vector.broadcast %cst_10 : f32 to vector<128x128xf32>
    %12 = arith.mulf %11, %10 : vector<128x128xf32>
    %cst_11 = arith.constant 0.594534874 : f32
    %13 = vector.broadcast %cst_11 : f32 to vector<128x128xf32>
    %14 = arith.mulf %13, %8 : vector<128x128xf32>
    %15 = arith.addf %12, %14 : vector<128x128xf32>
    %c0_12 = arith.constant 0 : index
    %c0_13 = arith.constant 0 : index
    %16 = vector.load %arg5[%c0_12, %c0_13] : memref<128x128xf32, #tpu.memory_space<vmem>>, vector<128x128xf32>
    tpu.vector_store %arg5[%c0_12, %c0_13], %15 {strides = array<i32>} : memref<128x128xf32, #tpu.memory_space<vmem>>, vector<128x128xf32>,
    return
  }
  func.func @transform_0(%arg0: i32) -> (i32, i32) {
    %c0_i32 = arith.constant 0 : i32
    %c0_i32_0 = arith.constant 0 : i32
    return %arg0, %c0_i32 : i32, i32
  }
  func.func @transform_1(%arg0: i32) -> (i32, i32) {
    %c0_i32 = arith.constant 0 : i32
    %c0_i32_0 = arith.constant 0 : i32
    %c0_i32_1 = arith.constant 0 : i32
    return %c0_i32, %c0_i32_0 : i32, i32
  }
  func.func @transform_2(%arg0: i32) -> (i32, i32) {
    %c0_i32 = arith.constant 0 : i32
    %c0_i32_0 = arith.constant 0 : i32
    return %arg0, %c0_i32 : i32, i32
  }
  func.func @transform_3(%arg0: i32) -> (i32, i32) {
    %c0_i32 = arith.constant 0 : i32
    %c0_i32_0 = arith.constant 0 : i32
    %c0_i32_1 = arith.constant 0 : i32
    return %c0_i32, %c0_i32_0 : i32, i32
  }
  func.func @transform_4(%arg0: i32) -> (i32, i32) {
    %c0_i32 = arith.constant 0 : i32
    %c0_i32_0 = arith.constant 0 : i32
    return %arg0, %c0_i32 : i32, i32
  }
}

module attributes {stable_mosaic.version = 11 : i64} {
  func.func @_gcnii_kernel_resident(%arg0: i32, %arg1: memref<128x256xf32, #tpu.memory_space<vmem>>, %arg2: memref<256x128xf32, #tpu.memory_space<vmem>>, %arg3: memref<128x128xf32, #tpu.memory_space<vmem>>, %arg4: memref<128x128xf32, #tpu.memory_space<vmem>>, %arg5: memref<128x128xf32, #tpu.memory_space<vmem>>) attributes {dimension_semantics = [#tpu.dimension_semantics<parallel>], iteration_bounds = array<i64: 2>, scalar_prefetch = 0 : i64, scratch_operands = 0 : i64, tpu.core_type = #tpu.core_type<tc>, window_params = [{transform_indices = @transform_0, window_bounds = array<i64: 128, 256>}, {pipeline_mode = #tpu.pipeline_mode<synchronous>, transform_indices = @transform_1, window_bounds = array<i64: 256, 128>}, {transform_indices = @transform_2, window_bounds = array<i64: 128, 128>}, {pipeline_mode = #tpu.pipeline_mode<synchronous>, transform_indices = @transform_3, window_bounds = array<i64: 128, 128>}, {transform_indices = @transform_4, window_bounds = array<i64: 128, 128>}]} {
    %c0 = arith.constant 0 : index
    %c0_0 = arith.constant 0 : index
    %0 = vector.load %arg1[%c0, %c0_0] : memref<128x256xf32, #tpu.memory_space<vmem>>, vector<128x256xf32>
    %c0_1 = arith.constant 0 : index
    %c0_2 = arith.constant 0 : index
    %1 = vector.load %arg2[%c0_1, %c0_2] : memref<256x128xf32, #tpu.memory_space<vmem>>, vector<256x128xf32>
    %cst = arith.constant dense<0.000000e+00> : vector<128x128xf32>
    %2 = tpu.matmul %0, %1, %cst {dimension_numbers = #tpu.dot_dimension_numbers<[1], [0], [0], [1], [0, 0, 1, 1], [], []>} : vector<128x256xf32>, vector<256x128xf32>, vector<128x128xf32> -> vector<128x128xf32>
    %cst_3 = arith.constant 0.899999976 : f32
    %3 = vector.broadcast %cst_3 : f32 to vector<128x128xf32>
    %4 = arith.mulf %3, %2 : vector<128x128xf32>
    %c0_4 = arith.constant 0 : index
    %c0_5 = arith.constant 0 : index
    %5 = vector.load %arg3[%c0_4, %c0_5] : memref<128x128xf32, #tpu.memory_space<vmem>>, vector<128x128xf32>
    %cst_6 = arith.constant 1.000000e-01 : f32
    %6 = vector.broadcast %cst_6 : f32 to vector<128x128xf32>
    %7 = arith.mulf %6, %5 : vector<128x128xf32>
    %8 = arith.addf %4, %7 : vector<128x128xf32>
    %c0_7 = arith.constant 0 : index
    %c0_8 = arith.constant 0 : index
    %9 = vector.load %arg4[%c0_7, %c0_8] : memref<128x128xf32, #tpu.memory_space<vmem>>, vector<128x128xf32>
    %cst_9 = arith.constant dense<0.000000e+00> : vector<128x128xf32>
    %10 = tpu.matmul %8, %9, %cst_9 {dimension_numbers = #tpu.dot_dimension_numbers<[1], [0], [0], [1], [0, 0, 1, 1], [], []>} : vector<128x128xf32>, vector<128x128xf32>, vector<128x128xf32> -> vector<128x128xf32>
    %cst_10 = arith.constant 0.405465096 : f32
    %11 = vector.broadcast %cst_10 : f32 to vector<128x128xf32>
    %12 = arith.mulf %11, %10 : vector<128x128xf32>
    %cst_11 = arith.constant 0.594534874 : f32
    %13 = vector.broadcast %cst_11 : f32 to vector<128x128xf32>
    %14 = arith.mulf %13, %8 : vector<128x128xf32>
    %15 = arith.addf %12, %14 : vector<128x128xf32>
    %c0_12 = arith.constant 0 : index
    %c0_13 = arith.constant 0 : index
    %16 = vector.load %arg5[%c0_12, %c0_13] : memref<128x128xf32, #tpu.memory_space<vmem>>, vector<128x128xf32>
    tpu.vector_store %arg5[%c0_12, %c0_13], %15 {strides = array<i32>} : memref<128x128xf32, #tpu.memory_space<vmem>>, vector<128x128xf32>,
    return
  }
  func.func @transform_0(%arg0: i32) -> (i32, i32) {
    %c0_i32 = arith.constant 0 : i32
    %c0_i32_0 = arith.constant 0 : i32
    return %arg0, %c0_i32 : i32, i32
  }
  func.func @transform_1(%arg0: i32) -> (i32, i32) {
    %c0_i32 = arith.constant 0 : i32
    %c0_i32_0 = arith.constant 0 : i32
    %c0_i32_1 = arith.constant 0 : i32
    return %c0_i32, %c0_i32_0 : i32, i32
  }
  func.func @transform_2(%arg0: i32) -> (i32, i32) {
    %c0_i32 = arith.constant 0 : i32
    %c0_i32_0 = arith.constant 0 : i32
    return %arg0, %c0_i32 : i32, i32
  }
  func.func @transform_3(%arg0: i32) -> (i32, i32) {
    %c0_i32 = arith.constant 0 : i32
    %c0_i32_0 = arith.constant 0 : i32
    %c0_i32_1 = arith.constant 0 : i32
    return %c0_i32, %c0_i32_0 : i32, i32
  }
  func.func @transform_4(%arg0: i32) -> (i32, i32) {
    %c0_i32 = arith.constant 0 : i32
    %c0_i32_0 = arith.constant 0 : i32
    return %arg0, %c0_i32 : i32, i32
  }
}

</mosaic_0001>

<bundles_post_ra>
// kernel: tpu_custom_call.1
= control target key start
LH: loop header
LB: loop body
LE: loop exit
PB: predicated region body
PF: predicated region fallthrough
CT: control target
= control target key end

     0   :  { %s1578_s0 = inlined_call_operand.hbm [shape: f32[256,256], index: 0, kind: input, shape index: {}]   ;;  %s1579_s1 = inlined_call_operand.hbm [shape: f32[256,128], index: 1, kind: input, shape index: {}]   ;;  %s1580_s2 = inlined_call_operand.hbm [shape: f32[256,128], index: 2, kind: input, shape index: {}]   ;;  %s1581_s3 = inlined_call_operand.hbm [shape: f32[128,128], index: 3, kind: input, shape index: {}]   ;;  %s1582_s4 = inlined_call_operand.hbm [shape: f32[256,128], index: 4, kind: output, shape index: {}]  }
   0x1   :  { %1592 = sst [smem:[#allocation19_spill]] %s1578_s0 }
   0x2   :  { %1593 = sst [smem:[#allocation20_spill]] %s1579_s1 }
   0x3   :  { %9 = vsyncpa [#allocation3], 0 }
   0x4   :  { %11 = vsyncpa [#allocation3 + $0x1], 0 }
   0x5   :  { %12 = vsyncpa [#allocation6], 0 }
   0x6   :  { %13 = vsyncpa [#allocation4], 0 }
   0x7   :  { %15 = vsyncpa [#allocation4 + $0x1], 0  ;;  %s1211_s15 = smov 0   ;;  %s1213_s16 = smov 0  }
   0x8   :  { %s1215_s17 = smov 0   ;;  %s1217_s18 = smov 0  }
   0x9 LB: > { %1594 = sst [smem:[#allocation15_spill]] %s1172_s17  ;;  %s1232_s19 = sadd.s32 4294967295, %s1176_s18   ;;  %s1176_s18 = sphi %s1217_s18, %s1614_s18   ;;  %s1172_s17 = sphi %s1215_s17, %s1616_s17   ;;  %s1168_s16 = sphi %s1213_s16, %s1618_s16   ;;  %s1164_s15 = sphi %s1211_s15, %s1617_s15  }
   0xa   : > { %s825_s20 = sadd.s32 4294967294, %s1176_s18   ;;  %p41_p0 = scmp.ne.s32.totalorder %s1168_s16, %s1164_s15 }
   0xb   : > { %p1587_p1 = scmp.eq.s32.totalorder %s1232_s19, 0  ;;  %p133_p2 = scmp.eq.s32.totalorder %s1232_s19, 1 }
   0xc   : > { %p139_p3 = scmp.eq.s32.totalorder %s825_s20, 1  ;;  %p826_p5 = scmp.ge.s32.totalorder %s1176_s18, 1 }
   0xd   : > { %p1241_p4 = por %p1587_p1, %p41_p0  ;;  %p146_p7 = scmp.lt.s32.totalorder %s1176_s18, 3 }
   0xe   : > { %p1246_p6 = por %p139_p3, %p41_p0  ;;  %s1598_s1 = sld [smem:[#allocation20_spill]] }
   0xf   : > { %p1254_p8 = pnand %p826_p5, %p146_p7  ;;  %s1178_s27 = smov [#allocation5]  }
  0x10   : > { %s1596_s22 = scalar_select %p1246_p6, 1, 0 }
  0x11   : > { %p914_p9 = pneg %p1254_p8  ;;  %s159_s28 = sshll.u32 %s1178_s27, 4  ;;  %s160_s28 = int_to_ptr.vmem [resolvable:$true] %s159_s28 }
  0x12   : > { %1597 = sst [smem:[#allocation16_spill]] %s1596_s22  ;;  %s1268_s30 = sadd.s32 1, %s1176_s18  }
  0x13   : > { %p1262_p10 = pnand %p914_p9, %p1587_p1  ;;  %1601 = sst [smem:[#allocation17_spill]] %s1268_s30 }
  0x14   : > { %s157_s25 = sshll.u32 %s1598_s1, 4  ;;  %s1583_s5 = smov 128   ;;  %s158_s25 = int_to_ptr.hbm [resolvable:$true] %s157_s25 }
  0x15   : > { %s1585_s6 = smov 8   ;;  %s25_s7 = ssub.s32 %s1176_s18, %s1268_s30 }
  0x16   : > { %917 = dma.hbm_to_vmem [thread:$0]  (!%p1262_p10), %s158_s25, 4096, %s160_s28, [#allocation6], %s1583_s5, %s1583_s5, %s1585_s6  }
  0x17   : > { %s28_s8 = sadd.s32 1, %s1172_s17  ;;  %p26_p12 = scmp.eq.s32.totalorder %s25_s7, 0 }
  0x18   : > { %p35_p13 = scmp.ne.s32.totalorder %s1172_s17, %s1168_s16  ;;  %p36_p0 = scmp.eq.s32.totalorder %s1176_s18, 0 }
  0x19   : > { %p934_p3 = scmp.lt.s32.totalorder %s1176_s18, 2  ;;  %s187_s11 = sand.u32 1, %s1176_s18  }
  0x1a   : > { %s1283_s9 = scalar_select %p26_p12, %s1172_s17, %s28_s8  }
  0x1b   : > { %p37_p5 = por %p36_p0, %p35_p13  ;;  %p1287_p7 = por %p133_p2, %p35_p13 }
  0x1c   : > { %1602 = sst [smem:[#allocation18_spill]] %s1283_s9  ;;  %s189_s12 = sand.u32 1, %s1172_s17  }
  0x1d   : > { %s830_s13 = sshll.u32 %s189_s12, 8  ;;  %s849_s14 = sshll.u32 %s1176_s18, 8 }
  0x1e   : > { %s1604_s0 = sld [smem:[#allocation19_spill]]  ;;  %s191_s25 = scalar_lea.vmem [#allocation2], %s830_s13 }
  0x1f   : > { %s200_s27 = sshll.u32 %s191_s25, 4  ;;  %p1299_p9 = pnand %p934_p3, %p37_p5  ;;  %s201_s27 = int_to_ptr.vmem [resolvable:$true] %s200_s27 }
  0x20   : > { %s834_s8 = sshll.u32 %s189_s12, 7  ;;  %s1303_s5 = scalar_lea.sflag [#allocation3], %s187_s11 }
  0x21   : > { %p1012_p12 = pneg %p1299_p9 }
  0x24   : > { %s197_s24 = scalar_lea.hbm %s1604_s0, %s849_s14  ;;  %s1015_s20 = scalar_lea.hbm %s1604_s0, 512 }
  0x25   : > { %s198_s28 = sshll.u32 %s197_s24, 4  ;;  %s199_s28 = int_to_ptr.hbm [resolvable:$true] %s198_s28 }
  0x26   : > { %s1008_s6 = sshra.s32 %s199_s28, 4  ;;  %s1009_s6 = int_to_ptr.hbm [resolvable:$true] %s1008_s6 }
  0x27   : > { %s1010_s1 = scalar_lea.hbm %s1009_s6, 256  ;;  %p1016_p3 = scmp.lt.s32.totalorder %s1009_s6, %s1604_s0 }
  0x28   : > { %p1011_p2 = scmp.ne.s32.totalorder %s1009_s6, %s1010_s1  ;;  %p1017_p5 = scmp.lt.s32.totalorder %s1015_s20, %s1010_s1 }
  0x2a   : > { %p1013_p13 = pnand %p1012_p12, %p1011_p2  ;;  %p1018_p11 = por %p1017_p5, %p1016_p3 }
  0x2c   : > { %p1014_p0 = pneg %p1013_p13 }
  0x2e   : > { %p1019_p1 = pnand %p1018_p11, %p1014_p0 }
  0x30   : > { %1022 = shalt.err (!%p1019_p1)
}
  0x31   : > { %s1181_s11 = smov 256   ;;  %s1182_s12 = smov 16  }
  0x32   : > { %924 = dma.hbm_to_vmem [thread:$0]  (!%p1299_p9), %s199_s28, 4096, %s201_s27, %s1303_s5, %s1181_s11, %s1181_s11, %s1182_s12  }
  0x33   : > { %s171_s13 = sshll.u32 %s1581_s3, 4  ;;  %s214_s14 = scalar_lea.vmem [#allocation7], %s834_s8  ;;  %s172_s13 = int_to_ptr.hbm [resolvable:$true] %s171_s13 }
  0x34   : > { %s222_s23 = sshll.u32 %s214_s14, 4  ;;  %s850_s1 = sshll.u32 %s1176_s18, 7  ;;  %s223_s23 = int_to_ptr.vmem [resolvable:$true] %s222_s23 }
  0x35   : > { %s1183_s6 = smov [#allocation8]   ;;  %s219_s17 = scalar_lea.hbm %s1580_s2, %s850_s1 }
  0x36   : > { %s173_s20 = sshll.u32 %s1183_s6, 4  ;;  %s220_s30 = sshll.u32 %s219_s17, 4  ;;  %s174_s20 = int_to_ptr.vmem [resolvable:$true] %s173_s20  ;;  %s221_s30 = int_to_ptr.hbm [resolvable:$true] %s220_s30 }
  0x37   : > { %s1606_s22 = smov 8   ;;  %s1607_s27 = smov 128  }
  0x38   : > { %920 = dma.hbm_to_vmem [thread:$0]  (!%p1262_p10), %s172_s13, 2048, %s174_s20, [#allocation6], %s1607_s27, %s1607_s27, %s1606_s22  }
  0x39   : > { %s1068_s9 = sshra.s32 %s221_s30, 4  ;;  %s1075_s11 = scalar_lea.hbm %s1580_s2, 256  ;;  %s1069_s9 = int_to_ptr.hbm [resolvable:$true] %s1068_s9 }
  0x3a   : > { %s1070_s28 = scalar_lea.hbm %s1069_s9, 128  ;;  %p1076_p13 = scmp.lt.s32.totalorder %s1069_s9, %s1580_s2 }
  0x3b   : > { %p1071_p1 = scmp.ne.s32.totalorder %s1069_s9, %s1070_s28  ;;  %p1077_p0 = scmp.lt.s32.totalorder %s1075_s11, %s1070_s28 }
  0x3d   : > { %p1073_p11 = pnand %p1071_p1, %p1012_p12  ;;  %p1078_p10 = por %p1077_p0, %p1076_p13 }
  0x3f   : > { %p1074_p2 = pneg %p1073_p11 }
  0x41   : > { %p1079_p3 = pnand %p1078_p10, %p1074_p2 }
  0x43   : > { %1082 = shalt.err (!%p1079_p3)
}
  0x44   : > { %927 = dma.hbm_to_vmem [thread:$0]  (!%p1299_p9), %s221_s30, 2048, %s223_s23, %s1303_s5, %s1607_s27, %s1607_s27, %s1606_s22  }
  0x45   : > { %234 = sbr.rel (%p1254_p8) target bundleno = 477 (0x1dd), region = 36  ;;  %s236_s12 = sand.u32 (!%p1254_p8), 1, %s1232_s19  }
  0x46   : > { %s1350_s25 = sand.u32 (!%p1254_p8), 1, %s1168_s16   ;;  %s237_s14 = scalar_lea.sflag (!%p1254_p8), [#allocation3], %s236_s12 }
  0x47   : > { %s838_s13 = sshll.u32 (!%p1254_p8), %s1350_s25, 8 }
  0x48   : > { %s1353_s1 = scalar_lea.vmem (!%p1254_p8), [#allocation2], %s838_s13 }
  0x4a   : > { %1143 = dma.done.wait (%p1241_p4), %s237_s14, 4096  }
  0x4b   : > { %1145 = vsyncadd (%p1241_p4), %s237_s14, 4294963200  ;;  %p1608_p9 = scmp.eq.s32.totalorder %s1232_s19, 0 }
  0x4d   : > { %1147 = dma.done.wait (%p1608_p9), [#allocation6], 4096   ;;  %p1609_p8 = pmov %p1608_p9 }
  0x4e   : > { %s840_s22 = sshll.u32 %s1350_s25, 7 }
  0x4f   : > { %1149 = vsyncadd (%p1609_p8), [#allocation6], 4294963200  ;;  %s1366_s26 = scalar_lea.vmem [#allocation7], %s840_s22 }
  0x50   : > { %1151 = dma.done.wait (%p1241_p4), %s237_s14, 2048  }
  0x51   : > { %1153 = vsyncadd (%p1241_p4), %s237_s14, 4294965248  ;;  %p1610_p12 = pmov %p1609_p8 }
  0x52   : > { %p1611_p5 = pmov %p1609_p8 }
  0x53   : > { %1155 = dma.done.wait (%p1610_p12), [#allocation6], 2048  }
  0x54   : > { %1157 = vsyncadd (%p1611_p5), [#allocation6], 4294965248  ;;  %v341_v0 = vld [vmem:[#allocation5 + $0x78] sm:$0xff]  ;;  %v340_v2 = vld [vmem:[#allocation5 + $0x70] sm:$0xff]  ;;  %s1511_s21 = scalar_lea.vmem [#allocation9], %s840_s22  ;;  %s851_s30 = sshll.u32 %s1232_s19, 7 }
  0x55   : > { %v1376_v1 = vld [vmem:[#allocation5 + $0xf8] sm:$0xff]  ;;  %358 = vmatpush.msra.mxu0 %v341_v0  ;;  %852 = vmatpush.msra.mxu3 %v341_v0  ;;  %v1378_v3 = vld [vmem:[#allocation5 + $0xf0] sm:$0xff]  ;;  %v339_v4 = vld [vmem:[#allocation5 + $0x68] sm:$0xff]  ;;  %s709_s23 = scalar_lea.hbm %s1582_s4, %s851_s30  ;;  %s710_s6 = sshll.u32 %s1511_s21, 4  ;;  %s711_s6 = int_to_ptr.vmem [resolvable:$true] %s710_s6 }
  0x56   : > { %423 = vmatpush.msra.mxu1 %v1376_v1  ;;  %v1381_v5 = vld [vmem:[#allocation5 + $0xe8] sm:$0xff]  ;;  %v338_v6 = vld [vmem:[#allocation5 + $0x60] sm:$0xff]  ;;  %v337_v8 = vld [vmem:[#allocation5 + $0x58] sm:$0xff]  ;;  %s712_s20 = sshll.u32 %s709_s23, 4  ;;  %s698_s24 = scalar_lea.sflag [#allocation4], %s1350_s25  ;;  %s713_s20 = int_to_ptr.hbm [resolvable:$true] %s712_s20 }
  0x57   : > { %359 = vmatpush.msra.mxu0 %v340_v2  ;;  %853 = vmatpush.msra.mxu3 %v340_v2  ;;  %v1384_v7 = vld [vmem:[#allocation5 + $0xe0] sm:$0xff]  ;;  %v1387_v9 = vld [vmem:[#allocation5 + $0xd8] sm:$0xff]  ;;  %v336_v10 = vld [vmem:[#allocation5 + $0x50] sm:$0xff]  ;;  %s1112_s27 = sshra.s32 %s713_s20, 4  ;;  %s1118_s8 = scalar_lea.hbm %s1582_s4, 256  ;;  %s1113_s27 = int_to_ptr.hbm [resolvable:$true] %s1112_s27 }
  0x58   : > { %424 = vmatpush.msra.mxu1 %v1378_v3  ;;  %v1390_v11 = vld [vmem:[#allocation5 + $0xd0] sm:$0xff]  ;;  %v335_v12 = vld [vmem:[#allocation5 + $0x48] sm:$0xff]  ;;  %v334_v14 = vld [vmem:[#allocation5 + $0x40] sm:$0xff]  ;;  %s1114_s19 = scalar_lea.hbm %s1113_s27, 128  ;;  %p1119_p2 = scmp.lt.s32.totalorder %s1113_s27, %s1582_s4 }
  0x59   : > { %360 = vmatpush.msra.mxu0 %v339_v4  ;;  %854 = vmatpush.msra.mxu3 %v339_v4  ;;  %v1393_v13 = vld [vmem:[#allocation5 + $0xc8] sm:$0xff]  ;;  %v1396_v15 = vld [vmem:[#allocation5 + $0xc0] sm:$0xff]  ;;  %v333_v16 = vld [vmem:[#allocation5 + $0x38] sm:$0xff]  ;;  %p1115_p4 = scmp.ne.s32.totalorder %s1113_s27, %s1114_s19  ;;  %p1120_p13 = scmp.lt.s32.totalorder %s1118_s8, %s1114_s19 }
  0x5a   : > { %425 = vmatpush.msra.mxu1 %v1381_v5  ;;  %v1399_v17 = vld [vmem:[#allocation5 + $0xb8] sm:$0xff]  ;;  %v332_v18 = vld [vmem:[#allocation5 + $0x30] sm:$0xff]  ;;  %v331_v20 = vld [vmem:[#allocation5 + $0x28] sm:$0xff] }
  0x5b   : > { %361 = vmatpush.msra.mxu0 %v338_v6  ;;  %855 = vmatpush.msra.mxu3 %v338_v6  ;;  %v348_v19 = vld [vmem:[#allocation5 + $0xb0] sm:$0xff]  ;;  %v347_v21 = vld [vmem:[#allocation5 + $0xa8] sm:$0xff]  ;;  %v330_v22 = vld [vmem:[#allocation5 + $0x20] sm:$0xff]  ;;  %p1116_p1 = pnand %p1115_p4, %p1287_p7  ;;  %p1121_p0 = por %p1120_p13, %p1119_p2 }
  0x5c   : > { %426 = vmatpush.msra.mxu1 %v1384_v7  ;;  %v346_v23 = vld [vmem:[#allocation5 + $0xa0] sm:$0xff]  ;;  %v329_v24 = vld [vmem:[#allocation5 + $0x18] sm:$0xff]  ;;  %v328_v26 = vld [vmem:[#allocation5 + $0x10] sm:$0xff] }
  0x5d   : > { %362 = vmatpush.msra.mxu0 %v337_v8  ;;  %856 = vmatpush.msra.mxu3 %v337_v8  ;;  %v345_v25 = vld [vmem:[#allocation5 + $0x98] sm:$0xff]  ;;  %v344_v27 = vld [vmem:[#allocation5 + $0x90] sm:$0xff]  ;;  %v327_v28 = vld [vmem:[#allocation5 + $0x8] sm:$0xff]  ;;  %p1117_p11 = pneg %p1116_p1 }
  0x5e   : > { %427 = vmatpush.msra.mxu1 %v1387_v9  ;;  %v343_v29 = vld [vmem:[#allocation5 + $0x88] sm:$0xff]  ;;  %v326_v30 = vld [vmem:[#allocation5] sm:$0xff]  ;;  %v296_v35 = vld [vmem:[%s1353_s1 + $0x10] sm:$0xff] }
  0x5f   : > { %363 = vmatpush.msra.mxu0 %v336_v10  ;;  %857 = vmatpush.msra.mxu3 %v336_v10  ;;  %v342_v31 = vld [vmem:[#allocation5 + $0x80] sm:$0xff]  ;;  %v295_v34 = vld [vmem:[%s1353_s1 + $0x8] sm:$0xff]  ;;  %v320_v36 = vld [vmem:[%s1353_s1 + $0xd0] sm:$0xff]  ;;  %p1122_p10 = pnand %p1121_p0, %p1117_p11 }
  0x60   : > { %428 = vmatpush.msra.mxu1 %v1390_v11  ;;  %v294_v32 = vld [vmem:[%s1353_s1] sm:$0xff]  ;;  %v297_v37 = vld [vmem:[%s1353_s1 + $0x18] sm:$0xff]  ;;  %v299_v40 = vld [vmem:[%s1353_s1 + $0x28] sm:$0xff] }
  0x61   : > { %364 = vmatpush.msra.mxu0 %v335_v12  ;;  %858 = vmatpush.msra.mxu3 %v335_v12  ;;  %v318_v33 = vld [vmem:[%s1353_s1 + $0xc0] sm:$0xff]  ;;  %v300_v41 = vld [vmem:[%s1353_s1 + $0x30] sm:$0xff]  ;;  %v301_v43 = vld [vmem:[%s1353_s1 + $0x38] sm:$0xff] }
  0x62   : > { %429 = vmatpush.msra.mxu1 %v1393_v13  ;;  %v298_v38 = vld [vmem:[%s1353_s1 + $0x20] sm:$0xff]  ;;  %v324_v42 = vld [vmem:[%s1353_s1 + $0xf0] sm:$0xff]  ;;  %v303_v45 = vld [vmem:[%s1353_s1 + $0x48] sm:$0xff] }
  0x63   : > { %365 = vmatpush.msra.mxu0 %v334_v14  ;;  %859 = vmatpush.msra.mxu3 %v334_v14  ;;  %v322_v39 = vld [vmem:[%s1353_s1 + $0xe0] sm:$0xff]  ;;  %v319_v46 = vld [vmem:[%s1353_s1 + $0xc8] sm:$0xff]  ;;  %v304_v47 = vld [vmem:[%s1353_s1 + $0x50] sm:$0xff] }
  0x64   : > { %430 = vmatpush.msra.mxu1 %v1396_v15  ;;  %v302_v44 = vld [vmem:[%s1353_s1 + $0x40] sm:$0xff]  ;;  %v305_v48 = vld [vmem:[%s1353_s1 + $0x58] sm:$0xff]  ;;  %v307_v51 = vld [vmem:[%s1353_s1 + $0x68] sm:$0xff] }
  0x65   : > { %366 = vmatpush.msra.mxu0 %v333_v16  ;;  %860 = vmatpush.msra.mxu3 %v333_v16  ;;  %v321_v49 = vld [vmem:[%s1353_s1 + $0xd8] sm:$0xff]  ;;  %v306_v50 = vld [vmem:[%s1353_s1 + $0x60] sm:$0xff]  ;;  %v323_v52 = vld [vmem:[%s1353_s1 + $0xe8] sm:$0xff] }
  0x66   : > { %431 = vmatpush.msra.mxu1 %v1399_v17  ;;  %v308_v53 = vld [vmem:[%s1353_s1 + $0x70] sm:$0xff]  ;;  %v309_v54 = vld [vmem:[%s1353_s1 + $0x78] sm:$0xff]  ;;  %v565_v58 = vld [vmem:[#allocation8 + $0x68] sm:$0xff] }
  0x67   : > { %367 = vmatpush.msra.mxu0 %v332_v18  ;;  %861 = vmatpush.msra.mxu3 %v332_v18  ;;  %v325_v55 = vld [vmem:[%s1353_s1 + $0xf8] sm:$0xff]  ;;  %v566_v57 = vld [vmem:[#allocation8 + $0x70] sm:$0xff]  ;;  %v310_v59 = vld [vmem:[%s1353_s1 + $0x80] sm:$0xff] }
  0x68   : > { %432 = vmatpush.msra.mxu1 %v348_v19  ;;  %v567_v56 = vld [vmem:[#allocation8 + $0x78] sm:$0xff]  ;;  %v564_v60 = vld [vmem:[#allocation8 + $0x60] sm:$0xff]  ;;  %v311_v61 = vld [vmem:[%s1353_s1 + $0x88] sm:$0xff] }
  0x69   : > { %368 = vmatpush.msra.mxu0 %v331_v20  ;;  %862 = vmatpush.msra.mxu3 %v331_v20  ;;  %v563_v62 = vld [vmem:[#allocation8 + $0x58] sm:$0xff]  ;;  %v562_v63 = vld [vmem:[#allocation8 + $0x50] sm:$0xff]  ;;  %v561_v0 = vld [vmem:[#allocation8 + $0x48] sm:$0xff] }
  0x6a   : > { %433 = vmatpush.msra.mxu1 %v347_v21  ;;  %568 = vmatpush.msra.mxu2 %v567_v56  ;;  %v560_v2 = vld [vmem:[#allocation8 + $0x40] sm:$0xff]  ;;  %v559_v4 = vld [vmem:[#allocation8 + $0x38] sm:$0xff]  ;;  %v557_v6 = vld [vmem:[#allocation8 + $0x28] sm:$0xff] }
  0x6b   : > { %369 = vmatpush.msra.mxu0 %v330_v22  ;;  %863 = vmatpush.msra.mxu3 %v330_v22  ;;  %v556_v8 = vld [vmem:[#allocation8 + $0x20] sm:$0xff]  ;;  %v316_v10 = vld [vmem:[%s1353_s1 + $0xb0] sm:$0xff]  ;;  %v555_v12 = vld [vmem:[#allocation8 + $0x18] sm:$0xff] }
  0x6c   : > { %434 = vmatpush.msra.mxu1 %v346_v23  ;;  %569 = vmatpush.msra.mxu2 %v566_v57  ;;  %v553_v14 = vld [vmem:[#allocation8 + $0x8] sm:$0xff]  ;;  %v504_v16 = vld [vmem:[%s1366_s26] sm:$0xff] }
  0x6d   : > { %370 = vmatpush.msra.mxu0 %v329_v24  ;;  %864 = vmatpush.msra.mxu3 %v329_v24  ;;  %v520_v20 = vmul.f32 0.1, %v504_v16  ;;  %v505_v24 = vld [vmem:[%s1366_s26 + $0x8] sm:$0xff]  ;;  %v518_v16 = vld [vmem:[%s1366_s26 + $0x70] sm:$0xff] }
  0x6e   : > { %435 = vmatpush.msra.mxu1 %v345_v25  ;;  %570 = vmatpush.msra.mxu2 %v565_v58 }
  0x6f   : > { %371 = vmatpush.msra.mxu0 %v328_v26  ;;  %865 = vmatpush.msra.mxu3 %v328_v26 }
  0x70   : > { %436 = vmatpush.msra.mxu1 %v344_v27  ;;  %571 = vmatpush.msra.mxu2 %v564_v60 }
  0x71   : > { %372 = vmatpush.msra.mxu0 %v327_v28  ;;  %866 = vmatpush.msra.mxu3 %v327_v28  ;;  %v521_v28 = vmul.f32 0.1, %v505_v24 }
  0x72   : > { %437 = vmatpush.msra.mxu1 %v343_v29  ;;  %572 = vmatpush.msra.mxu2 %v563_v62 }
  0x73   : > { %373 = vmatpush.msra.mxu0 %v326_v30  ;;  %867 = vmatpush.msra.mxu3 %v326_v30 }
  0x74   : > { %438 = vmatpush.msra.mxu1 %v342_v31  ;;  %374 = vmatmul.f32.vlgmr.msra.gmra.mxu0 %v294_v32  ;;  %v506_v32 = vld [vmem:[%s1366_s26 + $0x10] sm:$0xff] }
  0x75   : > { %410 = vmatmul.f32.vlgmr.msra.gmra.mxu3 %v318_v33  ;;  %439 = vmatmul.f32.vlgmr.msra.gmra.mxu1 %v295_v34 }
  0x76   : > { %868 = vmatpush.msrb.mxu3 %v1376_v1  ;;  %573 = vmatpush.msra.mxu2 %v562_v63  ;;  %v312_v1 = vld [vmem:[%s1353_s1 + $0x90] sm:$0xff] }
  0x78   : > { %869 = vmatpush.msrb.mxu3 %v1378_v3  ;;  %v313_v3 = vld [vmem:[%s1353_s1 + $0x98] sm:$0xff]  ;;  %574 = vmatpush.msra.mxu2 %v561_v0 }
  0x7a   : > { %870 = vmatpush.msrb.mxu3 %v1381_v5  ;;  %575 = vmatpush.msra.mxu2 %v560_v2  ;;  %v558_v5 = vld [vmem:[#allocation8 + $0x30] sm:$0xff] }
  0x7c   : > { %871 = vmatpush.msrb.mxu3 %v1384_v7  ;;  %377 = vmatmul.f32.gmra.mxu0 %v296_v35  ;;  %v314_v7 = vld [vmem:[%s1353_s1 + $0xa0] sm:$0xff] }
  0x7d   : > { %413 = vmatmul.f32.gmra.mxu3 %v320_v36  ;;  %442 = vmatmul.f32.gmra.mxu1 %v297_v37  ;;  %v522_v36 = vmul.f32 0.1, %v506_v32 }
  0x7e   : > { %872 = vmatpush.msrb.mxu3 %v1387_v9  ;;  %576 = vmatpush.msra.mxu2 %v559_v4  ;;  %v315_v9 = vld [vmem:[%s1353_s1 + $0xa8] sm:$0xff] }
  0x80   : > { %873 = vmatpush.msrb.mxu3 %v1390_v11  ;;  %577 = vmatpush.msra.mxu2 %v558_v5  ;;  %v317_v11 = vld [vmem:[%s1353_s1 + $0xb8] sm:$0xff] }
  0x82   : > { %874 = vmatpush.msrb.mxu3 %v1393_v13  ;;  %578 = vmatpush.msra.mxu2 %v557_v6  ;;  %v554_v13 = vld [vmem:[#allocation8 + $0x10] sm:$0xff] }
  0x84   : > { %875 = vmatpush.msrb.mxu3 %v1396_v15  ;;  %380 = vmatmul.f32.gmra.mxu0 %v298_v38  ;;  %v552_v15 = vld [vmem:[#allocation8] sm:$0xff] }
  0x85   : > { %416 = vmatmul.f32.gmra.mxu3 %v322_v39  ;;  %445 = vmatmul.f32.gmra.mxu1 %v299_v40  ;;  %v507_v40 = vld [vmem:[%s1366_s26 + $0x18] sm:$0xff] }
  0x86   : > { %876 = vmatpush.msrb.mxu3 %v1399_v17  ;;  %579 = vmatpush.msra.mxu2 %v556_v8 }
  0x88   : > { %877 = vmatpush.msrb.mxu3 %v348_v19  ;;  %580 = vmatpush.msra.mxu2 %v555_v12 }
  0x8a   : > { %878 = vmatpush.msrb.mxu3 %v347_v21  ;;  %581 = vmatpush.msra.mxu2 %v554_v13 }
  0x8c   : > { %879 = vmatpush.msrb.mxu3 %v346_v23  ;;  %383 = vmatmul.f32.gmra.mxu0 %v300_v41 }
  0x8d   : > { %419 = vmatmul.f32.gmra.mxu3 %v324_v42  ;;  %448 = vmatmul.f32.gmra.mxu1 %v301_v43 }
  0x8e   : > { %880 = vmatpush.msrb.mxu3 %v345_v25  ;;  %582 = vmatpush.msra.mxu2 %v553_v14 }
  0x90   : > { %881 = vmatpush.msrb.mxu3 %v344_v27  ;;  %583 = vmatpush.msra.mxu2 %v552_v15 }
  0x92   : > { %882 = vmatpush.msrb.mxu3 %v343_v29 }
  0x94   : > { %883 = vmatpush.msrb.mxu3 %v342_v31  ;;  %386 = vmatmul.f32.gmra.mxu0 %v302_v44  ;;  %v523_v44 = vmul.f32 0.1, %v507_v40 }
  0x95   : > { %451 = vmatmul.f32.gmra.mxu1 %v303_v45  ;;  %475 = vmatmul.f32.vlgmr.msrb.gmra.mxu3 %v319_v46 }
  0x96   : > { %884 = vmatpush.msra.mxu3 %v567_v56 }
  0x98   : > { %885 = vmatpush.msra.mxu3 %v566_v57  ;;  %v509_v57 = vld [vmem:[%s1366_s26 + $0x28] sm:$0xff] }
  0x9a   : > { %886 = vmatpush.msra.mxu3 %v565_v58 }
  0x9c   : > { %389 = vmatmul.f32.gmra.mxu0 %v304_v47  ;;  %887 = vmatpush.msra.mxu3 %v564_v60 }
  0x9d   : > { %454 = vmatmul.f32.gmra.mxu1 %v305_v48  ;;  %478 = vmatmul.f32.gmra.mxu3 %v321_v49  ;;  %v508_v48 = vld [vmem:[%s1366_s26 + $0x20] sm:$0xff] }
  0x9e   : > { %888 = vmatpush.msra.mxu3 %v563_v62 }
  0xa0   : > { %889 = vmatpush.msra.mxu3 %v562_v63 }
  0xa2   : > { %890 = vmatpush.msra.mxu3 %v561_v0  ;;  %v525_v0 = vmul.f32 0.1, %v509_v57 }
  0xa4   : > { %392 = vmatmul.f32.gmra.mxu0 %v306_v50  ;;  %891 = vmatpush.msra.mxu3 %v560_v2 }
  0xa5   : > { %457 = vmatmul.f32.gmra.mxu1 %v307_v51  ;;  %481 = vmatmul.f32.gmra.mxu3 %v323_v52  ;;  %v524_v52 = vmul.f32 0.1, %v508_v48  ;;  %v513_v48 = vld [vmem:[%s1366_s26 + $0x48] sm:$0xff] }
  0xa6   : > { %892 = vmatpush.msra.mxu3 %v559_v4 }
  0xa8   : > { %893 = vmatpush.msra.mxu3 %v558_v5 }
  0xaa   : > { %894 = vmatpush.msra.mxu3 %v557_v6  ;;  %v510_v6 = vld [vmem:[%s1366_s26 + $0x30] sm:$0xff] }
  0xac   : > { %395 = vmatmul.f32.gmra.mxu0 %v308_v53  ;;  %895 = vmatpush.msra.mxu3 %v556_v8 }
  0xad   : > { %460 = vmatmul.f32.gmra.mxu1 %v309_v54  ;;  %484 = vmatmul.f32.gmra.mxu3 %v325_v55  ;;  %v516_v54 = vld [vmem:[%s1366_s26 + $0x60] sm:$0xff] }
  0xae   : > { %896 = vmatpush.msra.mxu3 %v555_v12 }
  0xb0   : > { %897 = vmatpush.msra.mxu3 %v554_v13  ;;  %v526_v13 = vmul.f32 0.1, %v510_v6 }
  0xb2   : > { %898 = vmatpush.msra.mxu3 %v553_v14 }
  0xb4   : > { %398 = vmatmul.f32.gmra.mxu0 %v310_v59  ;;  %899 = vmatpush.msra.mxu3 %v552_v15  ;;  %v532_v59 = vmul.f32 0.1, %v516_v54  ;;  %v514_v54 = vld [vmem:[%s1366_s26 + $0x50] sm:$0xff] }
  0xb5   : > { %463 = vmatmul.f32.gmra.mxu1 %v311_v61 }
  0xbc   : > { %401 = vmatmul.f32.gmra.mxu0 %v312_v1 }
  0xbd   : > { %466 = vmatmul.f32.gmra.mxu1 %v313_v3  ;;  %v517_v3 = vld [vmem:[%s1366_s26 + $0x68] sm:$0xff] }
  0xc4   : > { %404 = vmatmul.f32.gmra.mxu0 %v314_v7 }
  0xc5   : > { %469 = vmatmul.f32.gmra.mxu1 %v315_v9  ;;  %v533_v9 = vmul.f32 0.1, %v517_v3 }
  0xcc   : > { %407 = vmatmul.f32.gmra.mxu0 %v316_v10 }
  0xcd   : > { %472 = vmatmul.f32.gmra.mxu1 %v317_v11 }
  0xf1   : > { %v375_v17 = vpop.f32.mrf.mxu0 }
  0xf2   : > { %v440_v18 = vpop.f32.mrf.mxu1 }
  0xf3   : > { %v441_v19 = vadd.f32 %v440_v18, %v375_v17 }
  0xf5   : > { %v488_v21 = vmul.f32 0.9, %v441_v19  ;;  %v511_v19 = vld [vmem:[%s1366_s26 + $0x38] sm:$0xff] }
  0xf7   : > { %v1445_v22 = vadd.f32 %v520_v20, %v488_v21 }
  0xf8   : > { %v411_v23 = vpop.f32.mrf.mxu3 }
  0xf9   : > { %584 = vmatmul.f32.vlgmr.msra.gmra.mxu2 %v1445_v22  ;;  %v378_v25 = vpop.f32.mrf.mxu0 }
  0xfa   : > { %v443_v26 = vpop.f32.mrf.mxu1 }
  0xfb   : > { %v444_v27 = vadd.f32 %v443_v26, %v378_v25 }
  0xfd   : > { %v489_v29 = vmul.f32 0.9, %v444_v27  ;;  %v527_v27 = vmul.f32 0.1, %v511_v19 }
  0xff   : > { %v1449_v30 = vadd.f32 %v521_v28, %v489_v29 }
 0x100   : > { %v414_v31 = vpop.f32.mrf.mxu3 }
 0x101   : > { %587 = vmatmul.f32.gmra.mxu2 %v1449_v30  ;;  %v381_v33 = vpop.f32.mrf.mxu0 }
 0x102   : > { %v446_v34 = vpop.f32.mrf.mxu1 }
 0x103   : > { %v447_v35 = vadd.f32 %v446_v34, %v381_v33  ;;  %v512_v34 = vld [vmem:[%s1366_s26 + $0x40] sm:$0xff] }
 0x105   : > { %v490_v37 = vmul.f32 0.9, %v447_v35 }
 0x107   : > { %v1453_v38 = vadd.f32 %v522_v36, %v490_v37 }
 0x108   : > { %v417_v39 = vpop.f32.mrf.mxu3 }
 0x109   : > { %590 = vmatmul.f32.gmra.mxu2 %v1453_v38  ;;  %v384_v41 = vpop.f32.mrf.mxu0 }
 0x10a   : > { %v449_v42 = vpop.f32.mrf.mxu1 }
 0x10b   : > { %v450_v43 = vadd.f32 %v449_v42, %v384_v41  ;;  %v528_v42 = vmul.f32 0.1, %v512_v34 }
 0x10d   : > { %v491_v45 = vmul.f32 0.9, %v450_v43 }
 0x10f   : > { %v1457_v46 = vadd.f32 %v523_v44, %v491_v45 }
 0x110   : > { %v420_v47 = vpop.f32.mrf.mxu3 }
 0x111   : > { %593 = vmatmul.f32.gmra.mxu2 %v1457_v46  ;;  %v387_v49 = vpop.f32.mrf.mxu0 }
 0x112   : > { %v452_v50 = vpop.f32.mrf.mxu1 }
 0x113   : > { %v453_v51 = vadd.f32 %v452_v50, %v387_v49 }
 0x115   : > { %v492_v53 = vmul.f32 0.9, %v453_v51  ;;  %v529_v51 = vmul.f32 0.1, %v513_v48 }
 0x117   : > { %v1462_v55 = vadd.f32 %v524_v52, %v492_v53 }
 0x118   : > { %v476_v56 = vpop.f32.mrf.mxu3 }
 0x119   : > { %v477_v58 = vadd.f32 %v476_v56, %v411_v23  ;;  %596 = vmatmul.f32.gmra.mxu2 %v1462_v55  ;;  %v390_v60 = vpop.f32.mrf.mxu0  ;;  %v534_v23 = vmul.f32 0.1, %v518_v16 }
 0x11a   : > { %v455_v61 = vpop.f32.mrf.mxu1 }
 0x11b   : > { %v500_v62 = vmul.f32 0.9, %v477_v58  ;;  %v456_v63 = vadd.f32 %v455_v61, %v390_v60 }
 0x11d   : > { %v1466_v1 = vadd.f32 %v532_v59, %v500_v62  ;;  %v493_v2 = vmul.f32 0.9, %v456_v63  ;;  %v530_v59 = vmul.f32 0.1, %v514_v54  ;;  %v515_v62 = vld [vmem:[%s1366_s26 + $0x58] sm:$0xff] }
 0x11e   : > { %v531_v3 = vmul.f32 0.1, %v515_v62 }
 0x11f   : > { %620 = vmatmul.f32.vlgmr.msra.gmra.mxu3 %v1466_v1  ;;  %v1470_v4 = vadd.f32 %v525_v0, %v493_v2 }
 0x120   : > { %v479_v5 = vpop.f32.mrf.mxu3 }
 0x121   : > { %v480_v7 = vadd.f32 %v479_v5, %v414_v31  ;;  %599 = vmatmul.f32.gmra.mxu2 %v1470_v4  ;;  %v393_v8 = vpop.f32.mrf.mxu0  ;;  %v519_v31 = vld [vmem:[%s1366_s26 + $0x78] sm:$0xff] }
 0x122   : > { %v458_v10 = vpop.f32.mrf.mxu1  ;;  %v535_v37 = vmul.f32 0.1, %v519_v31 }
 0x123   : > { %v501_v11 = vmul.f32 0.9, %v480_v7  ;;  %v459_v12 = vadd.f32 %v458_v10, %v393_v8  ;;  %v649_v8 = vmul.f32 0.5945349, %v1445_v22  ;;  %v651_v22 = vmul.f32 0.5945349, %v1453_v38 }
 0x124   : > { %v661_v38 = vmul.f32 0.5945349, %v1466_v1 }
 0x125   : > { %v494_v14 = vmul.f32 0.9, %v459_v12  ;;  %v1474_v15 = vadd.f32 %v533_v9, %v501_v11  ;;  %v650_v12 = vmul.f32 0.5945349, %v1449_v30  ;;  %v653_v30 = vmul.f32 0.5945349, %v1462_v55 }
 0x127   : > { %623 = vmatmul.f32.gmra.mxu3 %v1474_v15  ;;  %v1478_v17 = vadd.f32 %v526_v13, %v494_v14  ;;  %v662_v55 = vmul.f32 0.5945349, %v1474_v15 }
 0x128   : > { %v482_v18 = vpop.f32.mrf.mxu3 }
 0x129   : > { %v483_v20 = vadd.f32 %v482_v18, %v417_v39  ;;  %602 = vmatmul.f32.gmra.mxu2 %v1478_v17  ;;  %v396_v21 = vpop.f32.mrf.mxu0 }
 0x12a   : > { %v461_v24 = vpop.f32.mrf.mxu1 }
 0x12b   : > { %v502_v25 = vmul.f32 0.9, %v483_v20  ;;  %v462_v26 = vadd.f32 %v461_v24, %v396_v21  ;;  %v652_v21 = vmul.f32 0.5945349, %v1457_v46  ;;  %v654_v46 = vmul.f32 0.5945349, %v1470_v4 }
 0x12d   : > { %v495_v28 = vmul.f32 0.9, %v462_v26  ;;  %v1482_v29 = vadd.f32 %v534_v23, %v502_v25 }
 0x12f   : > { %626 = vmatmul.f32.gmra.mxu3 %v1482_v29  ;;  %v1486_v32 = vadd.f32 %v527_v27, %v495_v28  ;;  %v663_v48 = vmul.f32 0.5945349, %v1482_v29 }
 0x130   : > { %v485_v33 = vpop.f32.mrf.mxu3 }
 0x131   : > { %v486_v35 = vadd.f32 %v485_v33, %v420_v47  ;;  %605 = vmatmul.f32.gmra.mxu2 %v1486_v32  ;;  %v399_v36 = vpop.f32.mrf.mxu0  ;;  %v656_v15 = vmul.f32 0.5945349, %v1486_v32 }
 0x132   : > { %v464_v39 = vpop.f32.mrf.mxu1 }
 0x133   : > { %v503_v40 = vmul.f32 0.9, %v486_v35  ;;  %v465_v41 = vadd.f32 %v464_v39, %v399_v36 }
 0x135   : > { %v496_v43 = vmul.f32 0.9, %v465_v41  ;;  %v1490_v44 = vadd.f32 %v535_v37, %v503_v40  ;;  %v655_v41 = vmul.f32 0.5945349, %v1478_v17 }
 0x137   : > { %629 = vmatmul.f32.gmra.mxu3 %v1490_v44  ;;  %v1493_v45 = vadd.f32 %v528_v42, %v496_v43  ;;  %v664_v54 = vmul.f32 0.5945349, %v1490_v44 }
 0x139   : > { %608 = vmatmul.f32.gmra.mxu2 %v1493_v45  ;;  %v402_v47 = vpop.f32.mrf.mxu0  ;;  %v657_v29 = vmul.f32 0.5945349, %v1493_v45 }
 0x13a   : > { %v467_v49 = vpop.f32.mrf.mxu1 }
 0x13b   : > { %v468_v50 = vadd.f32 %v467_v49, %v402_v47 }
 0x13d   : > { %v497_v52 = vmul.f32 0.9, %v468_v50 }
 0x13f   : > { %v1497_v53 = vadd.f32 %v529_v51, %v497_v52 }
 0x141   : > { %611 = vmatmul.f32.gmra.mxu2 %v1497_v53  ;;  %v405_v56 = vpop.f32.mrf.mxu0  ;;  %v658_v62 = vmul.f32 0.5945349, %v1497_v53 }
 0x142   : > { %v470_v57 = vpop.f32.mrf.mxu1 }
 0x143   : > { %v471_v58 = vadd.f32 %v470_v57, %v405_v56 }
 0x145   : > { %v498_v60 = vmul.f32 0.9, %v471_v58 }
 0x147   : > { %v1501_v61 = vadd.f32 %v530_v59, %v498_v60 }
 0x149   : > { %614 = vmatmul.f32.gmra.mxu2 %v1501_v61  ;;  %v408_v63 = vpop.f32.mrf.mxu0 }
 0x14a   : > { %v473_v0 = vpop.f32.mrf.mxu1 }
 0x14b   : > { %v474_v2 = vadd.f32 %v473_v0, %v408_v63 }
 0x14d   : > { %v499_v5 = vmul.f32 0.9, %v474_v2  ;;  %v659_v2 = vmul.f32 0.5945349, %v1501_v61 }
 0x14f   : > { %v1505_v6 = vadd.f32 %v531_v3, %v499_v5 }
 0x151   : > { %617 = vmatmul.f32.gmra.mxu2 %v1505_v6  ;;  %v660_v5 = vmul.f32 0.5945349, %v1505_v6 }
 0x17c   : > { %v585_v7 = vpop.f32.mrf.mxu2 }
 0x17d   : > { %v633_v9 = vmul.f32 0.4054651, %v585_v7 }
 0x17f   : > { %v665_v10 = vadd.f32 %v649_v8, %v633_v9 }
 0x181   : > { %681 = vst [vmem:[%s1511_s21] sm:$0xff] %v665_v10 }
 0x184   : > { %v588_v11 = vpop.f32.mrf.mxu2 }
 0x185   : > { %v634_v13 = vmul.f32 0.4054651, %v588_v11 }
 0x187   : > { %v666_v14 = vadd.f32 %v650_v12, %v634_v13 }
 0x189   : > { %682 = vst [vmem:[%s1511_s21 + $0x8] sm:$0xff] %v666_v14 }
 0x18c   : > { %v591_v16 = vpop.f32.mrf.mxu2 }
 0x18d   : > { %v635_v18 = vmul.f32 0.4054651, %v591_v16 }
 0x18f   : > { %v667_v19 = vadd.f32 %v651_v22, %v635_v18 }
 0x191   : > { %683 = vst [vmem:[%s1511_s21 + $0x10] sm:$0xff] %v667_v19 }
 0x194   : > { %v594_v20 = vpop.f32.mrf.mxu2 }
 0x195   : > { %v636_v23 = vmul.f32 0.4054651, %v594_v20 }
 0x197   : > { %v668_v24 = vadd.f32 %v652_v21, %v636_v23 }
 0x199   : > { %684 = vst [vmem:[%s1511_s21 + $0x18] sm:$0xff] %v668_v24 }
 0x19c   : > { %v597_v25 = vpop.f32.mrf.mxu2 }
 0x19d   : > { %v637_v26 = vmul.f32 0.4054651, %v597_v25 }
 0x19f   : > { %v669_v27 = vadd.f32 %v653_v30, %v637_v26 }
 0x1a1   : > { %685 = vst [vmem:[%s1511_s21 + $0x20] sm:$0xff] %v669_v27 }
 0x1a2   : > { %v621_v28 = vpop.f32.mrf.mxu3 }
 0x1a3   : > { %v645_v31 = vmul.f32 0.4054651, %v621_v28 }
 0x1a4   : > { %v600_v33 = vpop.f32.mrf.mxu2 }
 0x1a5   : > { %v677_v34 = vadd.f32 %v661_v38, %v645_v31  ;;  %v638_v35 = vmul.f32 0.4054651, %v600_v33 }
 0x1a7   : > { %693 = vst [vmem:[%s1511_s21 + $0x60] sm:$0xff] %v677_v34  ;;  %v670_v36 = vadd.f32 %v654_v46, %v638_v35 }
 0x1a9   : > { %686 = vst [vmem:[%s1511_s21 + $0x28] sm:$0xff] %v670_v36 }
 0x1aa   : > { %v624_v37 = vpop.f32.mrf.mxu3 }
 0x1ab   : > { %v646_v39 = vmul.f32 0.4054651, %v624_v37 }
 0x1ac   : > { %v603_v40 = vpop.f32.mrf.mxu2 }
 0x1ad   : > { %v678_v42 = vadd.f32 %v662_v55, %v646_v39  ;;  %v639_v1 = vmul.f32 0.4054651, %v603_v40 }
 0x1af   : > { %694 = vst [vmem:[%s1511_s21 + $0x68] sm:$0xff] %v678_v42  ;;  %v671_v43 = vadd.f32 %v655_v41, %v639_v1 }
 0x1b1   : > { %687 = vst [vmem:[%s1511_s21 + $0x30] sm:$0xff] %v671_v43 }
 0x1b2   : > { %v627_v4 = vpop.f32.mrf.mxu3 }
 0x1b3   : > { %v647_v47 = vmul.f32 0.4054651, %v627_v4 }
 0x1b4   : > { %v606_v49 = vpop.f32.mrf.mxu2 }
 0x1b5   : > { %v679_v50 = vadd.f32 %v663_v48, %v647_v47  ;;  %v640_v51 = vmul.f32 0.4054651, %v606_v49 }
 0x1b7   : > { %695 = vst [vmem:[%s1511_s21 + $0x70] sm:$0xff] %v679_v50  ;;  %v672_v52 = vadd.f32 %v656_v15, %v640_v51 }
 0x1b9   : > { %688 = vst [vmem:[%s1511_s21 + $0x38] sm:$0xff] %v672_v52 }
 0x1ba   : > { %v630_v17 = vpop.f32.mrf.mxu3 }
 0x1bb   : > { %v648_v56 = vmul.f32 0.4054651, %v630_v17 }
 0x1bc   : > { %v609_v57 = vpop.f32.mrf.mxu2 }
 0x1bd   : > { %v680_v58 = vadd.f32 %v664_v54, %v648_v56  ;;  %v641_v59 = vmul.f32 0.4054651, %v609_v57 }
 0x1bf   : > { %696 = vst [vmem:[%s1511_s21 + $0x78] sm:$0xff] %v680_v58  ;;  %v673_v32 = vadd.f32 %v657_v29, %v641_v59 }
 0x1c1   : > { %689 = vst [vmem:[%s1511_s21 + $0x40] sm:$0xff] %v673_v32 }
 0x1c4   : > { %v612_v60 = vpop.f32.mrf.mxu2 }
 0x1c5   : > { %v642_v63 = vmul.f32 0.4054651, %v612_v60 }
 0x1c7   : > { %v674_v0 = vadd.f32 %v658_v62, %v642_v63 }
 0x1c9   : > { %690 = vst [vmem:[%s1511_s21 + $0x48] sm:$0xff] %v674_v0 }
 0x1cc   : > { %v615_v44 = vpop.f32.mrf.mxu2 }
 0x1cd   : > { %v643_v3 = vmul.f32 0.4054651, %v615_v44 }
 0x1cf   : > { %v675_v45 = vadd.f32 %v659_v2, %v643_v3 }
 0x1d1   : > { %691 = vst [vmem:[%s1511_s21 + $0x50] sm:$0xff] %v675_v45 }
 0x1d4   : > { %v618_v53 = vpop.f32.mrf.mxu2 }
 0x1d5   : > { %v644_v7 = vmul.f32 0.4054651, %v618_v53 }
 0x1d7   : > { %v676_v8 = vadd.f32 %v660_v5, %v644_v7 }
 0x1d9   : > { %692 = vst [vmem:[%s1511_s21 + $0x58] sm:$0xff] %v676_v8 }
 0x1da   : > { %1125 = shalt.err (!%p1122_p10)
}
 0x1db   : > { %s1184_s17 = smov 128   ;;  %s1185_s29 = smov 8  }
 0x1dc   : > { %912 = dma.vmem_to_hbm [thread:$0]  (%p1287_p7), %s711_s6, 2048, %s713_s20, %s698_s24, %s1184_s17, %s1184_s17, %s1185_s29  }
 0x1dd PF: > { %s727_s25 = sand.u32 1, %s1164_s15   ;;  %p1613_p3 = scmp.ge.s32.totalorder %s1176_s18, 2 }
 0x1de   : > { %s728_s13 = scalar_lea.sflag [#allocation4], %s727_s25 }
 0x1df   : > { %p929_p9 = pnand %p1613_p3, %p1246_p6 }
 0x1e1   : > { %p930_p8 = pneg %p929_p9 }
 0x1e3   : > { %1159 = dma.done.wait (%p930_p8), %s728_s13, 2048  }
 0x1e4   : > { %1161 = vsyncadd (%p930_p8), %s728_s13, 4294965248  ;;  %s1614_s18 = sld [smem:[#allocation17_spill]]  ;;  %s1617_s15 = smov %s1168_s16 }
 0x1e5   : > { %s1615_s14 = sld [smem:[#allocation15_spill]] }
 0x1e6   : > { %s1616_s17 = sld [smem:[#allocation18_spill]] }
 0x1ea   : > { %p18_p12 = scmp.ge.s32.totalorder %s1614_s18, 4  }
 0x1eb   : > { %s1618_s16 = smov %s1615_s14 }
 0x1ec   :  { %20 = sbr.rel (!%p18_p12) target bundleno = 9 (0x9), region = 100 }
 0x1f1   :  { %734 = vsyncpa [#allocation3], 1 }
 0x1f2   :  { %736 = vsyncpa [#allocation3 + $0x1], 1 }
 0x1f3   :  { %737 = vsyncpa [#allocation6], 1 }
 0x1f4   :  { %738 = vsyncpa [#allocation4], 1 }
 0x1f5   :  { %740 = vsyncpa [#allocation4 + $0x1], 1 }

// kernel: tpu_custom_call.1
= control target key start
LH: loop header
LB: loop body
LE: loop exit
PB: predicated region body
PF: predicated region fallthrough
CT: control target
= control target key end

     0   :  { %s1578_s0 = inlined_call_operand.hbm [shape: f32[256,256], index: 0, kind: input, shape index: {}]   ;;  %s1579_s1 = inlined_call_operand.hbm [shape: f32[256,128], index: 1, kind: input, shape index: {}]   ;;  %s1580_s2 = inlined_call_operand.hbm [shape: f32[256,128], index: 2, kind: input, shape index: {}]   ;;  %s1581_s3 = inlined_call_operand.hbm [shape: f32[128,128], index: 3, kind: input, shape index: {}]   ;;  %s1582_s4 = inlined_call_operand.hbm [shape: f32[256,128], index: 4, kind: output, shape index: {}]  }
   0x1   :  { %1592 = sst [smem:[#allocation19_spill]] %s1578_s0 }
   0x2   :  { %1593 = sst [smem:[#allocation20_spill]] %s1579_s1 }
   0x3   :  { %9 = vsyncpa [#allocation3], 0 }
   0x4   :  { %11 = vsyncpa [#allocation3 + $0x1], 0 }
   0x5   :  { %12 = vsyncpa [#allocation6], 0 }
   0x6   :  { %13 = vsyncpa [#allocation4], 0 }
   0x7   :  { %15 = vsyncpa [#allocation4 + $0x1], 0  ;;  %s1211_s15 = smov 0   ;;  %s1213_s16 = smov 0  }
   0x8   :  { %s1215_s17 = smov 0   ;;  %s1217_s18 = smov 0  }
   0x9 LB: > { %1594 = sst [smem:[#allocation15_spill]] %s1172_s17  ;;  %s1232_s19 = sadd.s32 4294967295, %s1176_s18   ;;  %s1176_s18 = sphi %s1217_s18, %s1614_s18   ;;  %s1172_s17 = sphi %s1215_s17, %s1616_s17   ;;  %s1168_s16 = sphi %s1213_s16, %s1618_s16   ;;  %s1164_s15 = sphi %s1211_s15, %s1617_s15  }
   0xa   : > { %s825_s20 = sadd.s32 4294967294, %s1176_s18   ;;  %p41_p0 = scmp.ne.s32.totalorder %s1168_s16, %s1164_s15 }
   0xb   : > { %p1587_p1 = scmp.eq.s32.totalorder %s1232_s19, 0  ;;  %p133_p2 = scmp.eq.s32.totalorder %s1232_s19, 1 }
   0xc   : > { %p139_p3 = scmp.eq.s32.totalorder %s825_s20, 1  ;;  %p826_p5 = scmp.ge.s32.totalorder %s1176_s18, 1 }
   0xd   : > { %p1241_p4 = por %p1587_p1, %p41_p0  ;;  %p146_p7 = scmp.lt.s32.totalorder %s1176_s18, 3 }
   0xe   : > { %p1246_p6 = por %p139_p3, %p41_p0  ;;  %s1598_s1 = sld [smem:[#allocation20_spill]] }
   0xf   : > { %p1254_p8 = pnand %p826_p5, %p146_p7  ;;  %s1178_s27 = smov [#allocation5]  }
  0x10   : > { %s1596_s22 = scalar_select %p1246_p6, 1, 0 }
  0x11   : > { %p914_p9 = pneg %p1254_p8  ;;  %s159_s28 = sshll.u32 %s1178_s27, 4  ;;  %s160_s28 = int_to_ptr.vmem [resolvable:$true] %s159_s28 }
  0x12   : > { %1597 = sst [smem:[#allocation16_spill]] %s1596_s22  ;;  %s1268_s30 = sadd.s32 1, %s1176_s18  }
  0x13   : > { %p1262_p10 = pnand %p914_p9, %p1587_p1  ;;  %1601 = sst [smem:[#allocation17_spill]] %s1268_s30 }
  0x14   : > { %s157_s25 = sshll.u32 %s1598_s1, 4  ;;  %s1583_s5 = smov 128   ;;  %s158_s25 = int_to_ptr.hbm [resolvable:$true] %s157_s25 }
  0x15   : > { %s1585_s6 = smov 8   ;;  %s25_s7 = ssub.s32 %s1176_s18, %s1268_s30 }
  0x16   : > { %917 = dma.hbm_to_vmem [thread:$0]  (!%p1262_p10), %s158_s25, 4096, %s160_s28, [#allocation6], %s1583_s5, %s1583_s5, %s1585_s6  }
  0x17   : > { %s28_s8 = sadd.s32 1, %s1172_s17  ;;  %p26_p12 = scmp.eq.s32.totalorder %s25_s7, 0 }
  0x18   : > { %p35_p13 = scmp.ne.s32.totalorder %s1172_s17, %s1168_s16  ;;  %p36_p0 = scmp.eq.s32.totalorder %s1176_s18, 0 }
  0x19   : > { %p934_p3 = scmp.lt.s32.totalorder %s1176_s18, 2  ;;  %s187_s11 = sand.u32 1, %s1176_s18  }
  0x1a   : > { %s1283_s9 = scalar_select %p26_p12, %s1172_s17, %s28_s8  }
  0x1b   : > { %p37_p5 = por %p36_p0, %p35_p13  ;;  %p1287_p7 = por %p133_p2, %p35_p13 }
  0x1c   : > { %1602 = sst [smem:[#allocation18_spill]] %s1283_s9  ;;  %s189_s12 = sand.u32 1, %s1172_s17  }
  0x1d   : > { %s830_s13 = sshll.u32 %s189_s12, 8  ;;  %s849_s14 = sshll.u32 %s1176_s18, 8 }
  0x1e   : > { %s1604_s0 = sld [smem:[#allocation19_spill]]  ;;  %s191_s25 = scalar_lea.vmem [#allocation2], %s830_s13 }
  0x1f   : > { %s200_s27 = sshll.u32 %s191_s25, 4  ;;  %p1299_p9 = pnand %p934_p3, %p37_p5  ;;  %s201_s27 = int_to_ptr.vmem [resolvable:$true] %s200_s27 }
  0x20   : > { %s834_s8 = sshll.u32 %s189_s12, 7  ;;  %s1303_s5 = scalar_lea.sflag [#allocation3], %s187_s11 }
  0x21   : > { %p1012_p12 = pneg %p1299_p9 }
  0x24   : > { %s197_s24 = scalar_lea.hbm %s1604_s0, %s849_s14  ;;  %s1015_s20 = scalar_lea.hbm %s1604_s0, 512 }
  0x25   : > { %s198_s28 = sshll.u32 %s197_s24, 4  ;;  %s199_s28 = int_to_ptr.hbm [resolvable:$true] %s198_s28 }
  0x26   : > { %s1008_s6 = sshra.s32 %s199_s28, 4  ;;  %s1009_s6 = int_to_ptr.hbm [resolvable:$true] %s1008_s6 }
  0x27   : > { %s1010_s1 = scalar_lea.hbm %s1009_s6, 256  ;;  %p1016_p3 = scmp.lt.s32.totalorder %s1009_s6, %s1604_s0 }
  0x28   : > { %p1011_p2 = scmp.ne.s32.totalorder %s1009_s6, %s1010_s1  ;;  %p1017_p5 = scmp.lt.s32.totalorder %s1015_s20, %s1010_s1 }
  0x2a   : > { %p1013_p13 = pnand %p1012_p12, %p1011_p2  ;;  %p1018_p11 = por %p1017_p5, %p1016_p3 }
  0x2c   : > { %p1014_p0 = pneg %p1013_p13 }
  0x2e   : > { %p1019_p1 = pnand %p1018_p11, %p1014_p0 }
  0x30   : > { %1022 = shalt.err (!%p1019_p1)
}
  0x31   : > { %s1181_s11 = smov 256   ;;  %s1182_s12 = smov 16  }
  0x32   : > { %924 = dma.hbm_to_vmem [thread:$0]  (!%p1299_p9), %s199_s28, 4096, %s201_s27, %s1303_s5, %s1181_s11, %s1181_s11, %s1182_s12  }
  0x33   : > { %s171_s13 = sshll.u32 %s1581_s3, 4  ;;  %s214_s14 = scalar_lea.vmem [#allocation7], %s834_s8  ;;  %s172_s13 = int_to_ptr.hbm [resolvable:$true] %s171_s13 }
  0x34   : > { %s222_s23 = sshll.u32 %s214_s14, 4  ;;  %s850_s1 = sshll.u32 %s1176_s18, 7  ;;  %s223_s23 = int_to_ptr.vmem [resolvable:$true] %s222_s23 }
  0x35   : > { %s1183_s6 = smov [#allocation8]   ;;  %s219_s17 = scalar_lea.hbm %s1580_s2, %s850_s1 }
  0x36   : > { %s173_s20 = sshll.u32 %s1183_s6, 4  ;;  %s220_s30 = sshll.u32 %s219_s17, 4  ;;  %s174_s20 = int_to_ptr.vmem [resolvable:$true] %s173_s20  ;;  %s221_s30 = int_to_ptr.hbm [resolvable:$true] %s220_s30 }
  0x37   : > { %s1606_s22 = smov 8   ;;  %s1607_s27 = smov 128  }
  0x38   : > { %920 = dma.hbm_to_vmem [thread:$0]  (!%p1262_p10), %s172_s13, 2048, %s174_s20, [#allocation6], %s1607_s27, %s1607_s27, %s1606_s22  }
  0x39   : > { %s1068_s9 = sshra.s32 %s221_s30, 4  ;;  %s1075_s11 = scalar_lea.hbm %s1580_s2, 256  ;;  %s1069_s9 = int_to_ptr.hbm [resolvable:$true] %s1068_s9 }
  0x3a   : > { %s1070_s28 = scalar_lea.hbm %s1069_s9, 128  ;;  %p1076_p13 = scmp.lt.s32.totalorder %s1069_s9, %s1580_s2 }
  0x3b   : > { %p1071_p1 = scmp.ne.s32.totalorder %s1069_s9, %s1070_s28  ;;  %p1077_p0 = scmp.lt.s32.totalorder %s1075_s11, %s1070_s28 }
  0x3d   : > { %p1073_p11 = pnand %p1071_p1, %p1012_p12  ;;  %p1078_p10 = por %p1077_p0, %p1076_p13 }
  0x3f   : > { %p1074_p2 = pneg %p1073_p11 }
  0x41   : > { %p1079_p3 = pnand %p1078_p10, %p1074_p2 }
  0x43   : > { %1082 = shalt.err (!%p1079_p3)
}
  0x44   : > { %927 = dma.hbm_to_vmem [thread:$0]  (!%p1299_p9), %s221_s30, 2048, %s223_s23, %s1303_s5, %s1607_s27, %s1607_s27, %s1606_s22  }
  0x45   : > { %234 = sbr.rel (%p1254_p8) target bundleno = 477 (0x1dd), region = 36  ;;  %s236_s12 = sand.u32 (!%p1254_p8), 1, %s1232_s19  }
  0x46   : > { %s1350_s25 = sand.u32 (!%p1254_p8), 1, %s1168_s16   ;;  %s237_s14 = scalar_lea.sflag (!%p1254_p8), [#allocation3], %s236_s12 }
  0x47   : > { %s838_s13 = sshll.u32 (!%p1254_p8), %s1350_s25, 8 }
  0x48   : > { %s1353_s1 = scalar_lea.vmem (!%p1254_p8), [#allocation2], %s838_s13 }
  0x4a   : > { %1143 = dma.done.wait (%p1241_p4), %s237_s14, 4096  }
  0x4b   : > { %1145 = vsyncadd (%p1241_p4), %s237_s14, 4294963200  ;;  %p1608_p9 = scmp.eq.s32.totalorder %s1232_s19, 0 }
  0x4d   : > { %1147 = dma.done.wait (%p1608_p9), [#allocation6], 4096   ;;  %p1609_p8 = pmov %p1608_p9 }
  0x4e   : > { %s840_s22 = sshll.u32 %s1350_s25, 7 }
  0x4f   : > { %1149 = vsyncadd (%p1609_p8), [#allocation6], 4294963200  ;;  %s1366_s26 = scalar_lea.vmem [#allocation7], %s840_s22 }
  0x50   : > { %1151 = dma.done.wait (%p1241_p4), %s237_s14, 2048  }
  0x51   : > { %1153 = vsyncadd (%p1241_p4), %s237_s14, 4294965248  ;;  %p1610_p12 = pmov %p1609_p8 }
  0x52   : > { %p1611_p5 = pmov %p1609_p8 }
  0x53   : > { %1155 = dma.done.wait (%p1610_p12), [#allocation6], 2048  }
  0x54   : > { %1157 = vsyncadd (%p1611_p5), [#allocation6], 4294965248  ;;  %v341_v0 = vld [vmem:[#allocation5 + $0x78] sm:$0xff]  ;;  %v340_v2 = vld [vmem:[#allocation5 + $0x70] sm:$0xff]  ;;  %s1511_s21 = scalar_lea.vmem [#allocation9], %s840_s22  ;;  %s851_s30 = sshll.u32 %s1232_s19, 7 }
  0x55   : > { %v1376_v1 = vld [vmem:[#allocation5 + $0xf8] sm:$0xff]  ;;  %358 = vmatpush.msra.mxu0 %v341_v0  ;;  %852 = vmatpush.msra.mxu3 %v341_v0  ;;  %v1378_v3 = vld [vmem:[#allocation5 + $0xf0] sm:$0xff]  ;;  %v339_v4 = vld [vmem:[#allocation5 + $0x68] sm:$0xff]  ;;  %s709_s23 = scalar_lea.hbm %s1582_s4, %s851_s30  ;;  %s710_s6 = sshll.u32 %s1511_s21, 4  ;;  %s711_s6 = int_to_ptr.vmem [resolvable:$true] %s710_s6 }
  0x56   : > { %423 = vmatpush.msra.mxu1 %v1376_v1  ;;  %v1381_v5 = vld [vmem:[#allocation5 + $0xe8] sm:$0xff]  ;;  %v338_v6 = vld [vmem:[#allocation5 + $0x60] sm:$0xff]  ;;  %v337_v8 = vld [vmem:[#allocation5 + $0x58] sm:$0xff]  ;;  %s712_s20 = sshll.u32 %s709_s23, 4  ;;  %s698_s24 = scalar_lea.sflag [#allocation4], %s1350_s25  ;;  %s713_s20 = int_to_ptr.hbm [resolvable:$true] %s712_s20 }
  0x57   : > { %359 = vmatpush.msra.mxu0 %v340_v2  ;;  %853 = vmatpush.msra.mxu3 %v340_v2  ;;  %v1384_v7 = vld [vmem:[#allocation5 + $0xe0] sm:$0xff]  ;;  %v1387_v9 = vld [vmem:[#allocation5 + $0xd8] sm:$0xff]  ;;  %v336_v10 = vld [vmem:[#allocation5 + $0x50] sm:$0xff]  ;;  %s1112_s27 = sshra.s32 %s713_s20, 4  ;;  %s1118_s8 = scalar_lea.hbm %s1582_s4, 256  ;;  %s1113_s27 = int_to_ptr.hbm [resolvable:$true] %s1112_s27 }
  0x58   : > { %424 = vmatpush.msra.mxu1 %v1378_v3  ;;  %v1390_v11 = vld [vmem:[#allocation5 + $0xd0] sm:$0xff]  ;;  %v335_v12 = vld [vmem:[#allocation5 + $0x48] sm:$0xff]  ;;  %v334_v14 = vld [vmem:[#allocation5 + $0x40] sm:$0xff]  ;;  %s1114_s19 = scalar_lea.hbm %s1113_s27, 128  ;;  %p1119_p2 = scmp.lt.s32.totalorder %s1113_s27, %s1582_s4 }
  0x59   : > { %360 = vmatpush.msra.mxu0 %v339_v4  ;;  %854 = vmatpush.msra.mxu3 %v339_v4  ;;  %v1393_v13 = vld [vmem:[#allocation5 + $0xc8] sm:$0xff]  ;;  %v1396_v15 = vld [vmem:[#allocation5 + $0xc0] sm:$0xff]  ;;  %v333_v16 = vld [vmem:[#allocation5 + $0x38] sm:$0xff]  ;;  %p1115_p4 = scmp.ne.s32.totalorder %s1113_s27, %s1114_s19  ;;  %p1120_p13 = scmp.lt.s32.totalorder %s1118_s8, %s1114_s19 }
  0x5a   : > { %425 = vmatpush.msra.mxu1 %v1381_v5  ;;  %v1399_v17 = vld [vmem:[#allocation5 + $0xb8] sm:$0xff]  ;;  %v332_v18 = vld [vmem:[#allocation5 + $0x30] sm:$0xff]  ;;  %v331_v20 = vld [vmem:[#allocation5 + $0x28] sm:$0xff] }
  0x5b   : > { %361 = vmatpush.msra.mxu0 %v338_v6  ;;  %855 = vmatpush.msra.mxu3 %v338_v6  ;;  %v348_v19 = vld [vmem:[#allocation5 + $0xb0] sm:$0xff]  ;;  %v347_v21 = vld [vmem:[#allocation5 + $0xa8] sm:$0xff]  ;;  %v330_v22 = vld [vmem:[#allocation5 + $0x20] sm:$0xff]  ;;  %p1116_p1 = pnand %p1115_p4, %p1287_p7  ;;  %p1121_p0 = por %p1120_p13, %p1119_p2 }
  0x5c   : > { %426 = vmatpush.msra.mxu1 %v1384_v7  ;;  %v346_v23 = vld [vmem:[#allocation5 + $0xa0] sm:$0xff]  ;;  %v329_v24 = vld [vmem:[#allocation5 + $0x18] sm:$0xff]  ;;  %v328_v26 = vld [vmem:[#allocation5 + $0x10] sm:$0xff] }
  0x5d   : > { %362 = vmatpush.msra.mxu0 %v337_v8  ;;  %856 = vmatpush.msra.mxu3 %v337_v8  ;;  %v345_v25 = vld [vmem:[#allocation5 + $0x98] sm:$0xff]  ;;  %v344_v27 = vld [vmem:[#allocation5 + $0x90] sm:$0xff]  ;;  %v327_v28 = vld [vmem:[#allocation5 + $0x8] sm:$0xff]  ;;  %p1117_p11 = pneg %p1116_p1 }
  0x5e   : > { %427 = vmatpush.msra.mxu1 %v1387_v9  ;;  %v343_v29 = vld [vmem:[#allocation5 + $0x88] sm:$0xff]  ;;  %v326_v30 = vld [vmem:[#allocation5] sm:$0xff]  ;;  %v296_v35 = vld [vmem:[%s1353_s1 + $0x10] sm:$0xff] }
  0x5f   : > { %363 = vmatpush.msra.mxu0 %v336_v10  ;;  %857 = vmatpush.msra.mxu3 %v336_v10  ;;  %v342_v31 = vld [vmem:[#allocation5 + $0x80] sm:$0xff]  ;;  %v295_v34 = vld [vmem:[%s1353_s1 + $0x8] sm:$0xff]  ;;  %v320_v36 = vld [vmem:[%s1353_s1 + $0xd0] sm:$0xff]  ;;  %p1122_p10 = pnand %p1121_p0, %p1117_p11 }
  0x60   : > { %428 = vmatpush.msra.mxu1 %v1390_v11  ;;  %v294_v32 = vld [vmem:[%s1353_s1] sm:$0xff]  ;;  %v297_v37 = vld [vmem:[%s1353_s1 + $0x18] sm:$0xff]  ;;  %v299_v40 = vld [vmem:[%s1353_s1 + $0x28] sm:$0xff] }
  0x61   : > { %364 = vmatpush.msra.mxu0 %v335_v12  ;;  %858 = vmatpush.msra.mxu3 %v335_v12  ;;  %v318_v33 = vld [vmem:[%s1353_s1 + $0xc0] sm:$0xff]  ;;  %v300_v41 = vld [vmem:[%s1353_s1 + $0x30] sm:$0xff]  ;;  %v301_v43 = vld [vmem:[%s1353_s1 + $0x38] sm:$0xff] }
  0x62   : > { %429 = vmatpush.msra.mxu1 %v1393_v13  ;;  %v298_v38 = vld [vmem:[%s1353_s1 + $0x20] sm:$0xff]  ;;  %v324_v42 = vld [vmem:[%s1353_s1 + $0xf0] sm:$0xff]  ;;  %v303_v45 = vld [vmem:[%s1353_s1 + $0x48] sm:$0xff] }
  0x63   : > { %365 = vmatpush.msra.mxu0 %v334_v14  ;;  %859 = vmatpush.msra.mxu3 %v334_v14  ;;  %v322_v39 = vld [vmem:[%s1353_s1 + $0xe0] sm:$0xff]  ;;  %v319_v46 = vld [vmem:[%s1353_s1 + $0xc8] sm:$0xff]  ;;  %v304_v47 = vld [vmem:[%s1353_s1 + $0x50] sm:$0xff] }
  0x64   : > { %430 = vmatpush.msra.mxu1 %v1396_v15  ;;  %v302_v44 = vld [vmem:[%s1353_s1 + $0x40] sm:$0xff]  ;;  %v305_v48 = vld [vmem:[%s1353_s1 + $0x58] sm:$0xff]  ;;  %v307_v51 = vld [vmem:[%s1353_s1 + $0x68] sm:$0xff] }
  0x65   : > { %366 = vmatpush.msra.mxu0 %v333_v16  ;;  %860 = vmatpush.msra.mxu3 %v333_v16  ;;  %v321_v49 = vld [vmem:[%s1353_s1 + $0xd8] sm:$0xff]  ;;  %v306_v50 = vld [vmem:[%s1353_s1 + $0x60] sm:$0xff]  ;;  %v323_v52 = vld [vmem:[%s1353_s1 + $0xe8] sm:$0xff] }
  0x66   : > { %431 = vmatpush.msra.mxu1 %v1399_v17  ;;  %v308_v53 = vld [vmem:[%s1353_s1 + $0x70] sm:$0xff]  ;;  %v309_v54 = vld [vmem:[%s1353_s1 + $0x78] sm:$0xff]  ;;  %v565_v58 = vld [vmem:[#allocation8 + $0x68] sm:$0xff] }
  0x67   : > { %367 = vmatpush.msra.mxu0 %v332_v18  ;;  %861 = vmatpush.msra.mxu3 %v332_v18  ;;  %v325_v55 = vld [vmem:[%s1353_s1 + $0xf8] sm:$0xff]  ;;  %v566_v57 = vld [vmem:[#allocation8 + $0x70] sm:$0xff]  ;;  %v310_v59 = vld [vmem:[%s1353_s1 + $0x80] sm:$0xff] }
  0x68   : > { %432 = vmatpush.msra.mxu1 %v348_v19  ;;  %v567_v56 = vld [vmem:[#allocation8 + $0x78] sm:$0xff]  ;;  %v564_v60 = vld [vmem:[#allocation8 + $0x60] sm:$0xff]  ;;  %v311_v61 = vld [vmem:[%s1353_s1 + $0x88] sm:$0xff] }
  0x69   : > { %368 = vmatpush.msra.mxu0 %v331_v20  ;;  %862 = vmatpush.msra.mxu3 %v331_v20  ;;  %v563_v62 = vld [vmem:[#allocation8 + $0x58] sm:$0xff]  ;;  %v562_v63 = vld [vmem:[#allocation8 + $0x50] sm:$0xff]  ;;  %v561_v0 = vld [vmem:[#allocation8 + $0x48] sm:$0xff] }
  0x6a   : > { %433 = vmatpush.msra.mxu1 %v347_v21  ;;  %568 = vmatpush.msra.mxu2 %v567_v56  ;;  %v560_v2 = vld [vmem:[#allocation8 + $0x40] sm:$0xff]  ;;  %v559_v4 = vld [vmem:[#allocation8 + $0x38] sm:$0xff]  ;;  %v557_v6 = vld [vmem:[#allocation8 + $0x28] sm:$0xff] }
  0x6b   : > { %369 = vmatpush.msra.mxu0 %v330_v22  ;;  %863 = vmatpush.msra.mxu3 %v330_v22  ;;  %v556_v8 = vld [vmem:[#allocation8 + $0x20] sm:$0xff]  ;;  %v316_v10 = vld [vmem:[%s1353_s1 + $0xb0] sm:$0xff]  ;;  %v555_v12 = vld [vmem:[#allocation8 + $0x18] sm:$0xff] }
  0x6c   : > { %434 = vmatpush.msra.mxu1 %v346_v23  ;;  %569 = vmatpush.msra.mxu2 %v566_v57  ;;  %v553_v14 = vld [vmem:[#allocation8 + $0x8] sm:$0xff]  ;;  %v504_v16 = vld [vmem:[%s1366_s26] sm:$0xff] }
  0x6d   : > { %370 = vmatpush.msra.mxu0 %v329_v24  ;;  %864 = vmatpush.msra.mxu3 %v329_v24  ;;  %v520_v20 = vmul.f32 0.1, %v504_v16  ;;  %v505_v24 = vld [vmem:[%s1366_s26 + $0x8] sm:$0xff]  ;;  %v518_v16 = vld [vmem:[%s1366_s26 + $0x70] sm:$0xff] }
  0x6e   : > { %435 = vmatpush.msra.mxu1 %v345_v25  ;;  %570 = vmatpush.msra.mxu2 %v565_v58 }
  0x6f   : > { %371 = vmatpush.msra.mxu0 %v328_v26  ;;  %865 = vmatpush.msra.mxu3 %v328_v26 }
  0x70   : > { %436 = vmatpush.msra.mxu1 %v344_v27  ;;  %571 = vmatpush.msra.mxu2 %v564_v60 }
  0x71   : > { %372 = vmatpush.msra.mxu0 %v327_v28  ;;  %866 = vmatpush.msra.mxu3 %v327_v28  ;;  %v521_v28 = vmul.f32 0.1, %v505_v24 }
  0x72   : > { %437 = vmatpush.msra.mxu1 %v343_v29  ;;  %572 = vmatpush.msra.mxu2 %v563_v62 }
  0x73   : > { %373 = vmatpush.msra.mxu0 %v326_v30  ;;  %867 = vmatpush.msra.mxu3 %v326_v30 }
  0x74   : > { %438 = vmatpush.msra.mxu1 %v342_v31  ;;  %374 = vmatmul.f32.vlgmr.msra.gmra.mxu0 %v294_v32  ;;  %v506_v32 = vld [vmem:[%s1366_s26 + $0x10] sm:$0xff] }
  0x75   : > { %410 = vmatmul.f32.vlgmr.msra.gmra.mxu3 %v318_v33  ;;  %439 = vmatmul.f32.vlgmr.msra.gmra.mxu1 %v295_v34 }
  0x76   : > { %868 = vmatpush.msrb.mxu3 %v1376_v1  ;;  %573 = vmatpush.msra.mxu2 %v562_v63  ;;  %v312_v1 = vld [vmem:[%s1353_s1 + $0x90] sm:$0xff] }
  0x78   : > { %869 = vmatpush.msrb.mxu3 %v1378_v3  ;;  %v313_v3 = vld [vmem:[%s1353_s1 + $0x98] sm:$0xff]  ;;  %574 = vmatpush.msra.mxu2 %v561_v0 }
  0x7a   : > { %870 = vmatpush.msrb.mxu3 %v1381_v5  ;;  %575 = vmatpush.msra.mxu2 %v560_v2  ;;  %v558_v5 = vld [vmem:[#allocation8 + $0x30] sm:$0xff] }
  0x7c   : > { %871 = vmatpush.msrb.mxu3 %v1384_v7  ;;  %377 = vmatmul.f32.gmra.mxu0 %v296_v35  ;;  %v314_v7 = vld [vmem:[%s1353_s1 + $0xa0] sm:$0xff] }
  0x7d   : > { %413 = vmatmul.f32.gmra.mxu3 %v320_v36  ;;  %442 = vmatmul.f32.gmra.mxu1 %v297_v37  ;;  %v522_v36 = vmul.f32 0.1, %v506_v32 }
  0x7e   : > { %872 = vmatpush.msrb.mxu3 %v1387_v9  ;;  %576 = vmatpush.msra.mxu2 %v559_v4  ;;  %v315_v9 = vld [vmem:[%s1353_s1 + $0xa8] sm:$0xff] }
  0x80   : > { %873 = vmatpush.msrb.mxu3 %v1390_v11  ;;  %577 = vmatpush.msra.mxu2 %v558_v5  ;;  %v317_v11 = vld [vmem:[%s1353_s1 + $0xb8] sm:$0xff] }
  0x82   : > { %874 = vmatpush.msrb.mxu3 %v1393_v13  ;;  %578 = vmatpush.msra.mxu2 %v557_v6  ;;  %v554_v13 = vld [vmem:[#allocation8 + $0x10] sm:$0xff] }
  0x84   : > { %875 = vmatpush.msrb.mxu3 %v1396_v15  ;;  %380 = vmatmul.f32.gmra.mxu0 %v298_v38  ;;  %v552_v15 = vld [vmem:[#allocation8] sm:$0xff] }
  0x85   : > { %416 = vmatmul.f32.gmra.mxu3 %v322_v39  ;;  %445 = vmatmul.f32.gmra.mxu1 %v299_v40  ;;  %v507_v40 = vld [vmem:[%s1366_s26 + $0x18] sm:$0xff] }
  0x86   : > { %876 = vmatpush.msrb.mxu3 %v1399_v17  ;;  %579 = vmatpush.msra.mxu2 %v556_v8 }
  0x88   : > { %877 = vmatpush.msrb.mxu3 %v348_v19  ;;  %580 = vmatpush.msra.mxu2 %v555_v12 }
  0x8a   : > { %878 = vmatpush.msrb.mxu3 %v347_v21  ;;  %581 = vmatpush.msra.mxu2 %v554_v13 }
  0x8c   : > { %879 = vmatpush.msrb.mxu3 %v346_v23  ;;  %383 = vmatmul.f32.gmra.mxu0 %v300_v41 }
  0x8d   : > { %419 = vmatmul.f32.gmra.mxu3 %v324_v42  ;;  %448 = vmatmul.f32.gmra.mxu1 %v301_v43 }
  0x8e   : > { %880 = vmatpush.msrb.mxu3 %v345_v25  ;;  %582 = vmatpush.msra.mxu2 %v553_v14 }
  0x90   : > { %881 = vmatpush.msrb.mxu3 %v344_v27  ;;  %583 = vmatpush.msra.mxu2 %v552_v15 }
  0x92   : > { %882 = vmatpush.msrb.mxu3 %v343_v29 }
  0x94   : > { %883 = vmatpush.msrb.mxu3 %v342_v31  ;;  %386 = vmatmul.f32.gmra.mxu0 %v302_v44  ;;  %v523_v44 = vmul.f32 0.1, %v507_v40 }
  0x95   : > { %451 = vmatmul.f32.gmra.mxu1 %v303_v45  ;;  %475 = vmatmul.f32.vlgmr.msrb.gmra.mxu3 %v319_v46 }
  0x96   : > { %884 = vmatpush.msra.mxu3 %v567_v56 }
  0x98   : > { %885 = vmatpush.msra.mxu3 %v566_v57  ;;  %v509_v57 = vld [vmem:[%s1366_s26 + $0x28] sm:$0xff] }
  0x9a   : > { %886 = vmatpush.msra.mxu3 %v565_v58 }
  0x9c   : > { %389 = vmatmul.f32.gmra.mxu0 %v304_v47  ;;  %887 = vmatpush.msra.mxu3 %v564_v60 }
  0x9d   : > { %454 = vmatmul.f32.gmra.mxu1 %v305_v48  ;;  %478 = vmatmul.f32.gmra.mxu3 %v321_v49  ;;  %v508_v48 = vld [vmem:[%s1366_s26 + $0x20] sm:$0xff] }
  0x9e   : > { %888 = vmatpush.msra.mxu3 %v563_v62 }
  0xa0   : > { %889 = vmatpush.msra.mxu3 %v562_v63 }
  0xa2   : > { %890 = vmatpush.msra.mxu3 %v561_v0  ;;  %v525_v0 = vmul.f32 0.1, %v509_v57 }
  0xa4   : > { %392 = vmatmul.f32.gmra.mxu0 %v306_v50  ;;  %891 = vmatpush.msra.mxu3 %v560_v2 }
  0xa5   : > { %457 = vmatmul.f32.gmra.mxu1 %v307_v51  ;;  %481 = vmatmul.f32.gmra.mxu3 %v323_v52  ;;  %v524_v52 = vmul.f32 0.1, %v508_v48  ;;  %v513_v48 = vld [vmem:[%s1366_s26 + $0x48] sm:$0xff] }
  0xa6   : > { %892 = vmatpush.msra.mxu3 %v559_v4 }
  0xa8   : > { %893 = vmatpush.msra.mxu3 %v558_v5 }
  0xaa   : > { %894 = vmatpush.msra.mxu3 %v557_v6  ;;  %v510_v6 = vld [vmem:[%s1366_s26 + $0x30] sm:$0xff] }
  0xac   : > { %395 = vmatmul.f32.gmra.mxu0 %v308_v53  ;;  %895 = vmatpush.msra.mxu3 %v556_v8 }
  0xad   : > { %460 = vmatmul.f32.gmra.mxu1 %v309_v54  ;;  %484 = vmatmul.f32.gmra.mxu3 %v325_v55  ;;  %v516_v54 = vld [vmem:[%s1366_s26 + $0x60] sm:$0xff] }
  0xae   : > { %896 = vmatpush.msra.mxu3 %v555_v12 }
  0xb0   : > { %897 = vmatpush.msra.mxu3 %v554_v13  ;;  %v526_v13 = vmul.f32 0.1, %v510_v6 }
  0xb2   : > { %898 = vmatpush.msra.mxu3 %v553_v14 }
  0xb4   : > { %398 = vmatmul.f32.gmra.mxu0 %v310_v59  ;;  %899 = vmatpush.msra.mxu3 %v552_v15  ;;  %v532_v59 = vmul.f32 0.1, %v516_v54  ;;  %v514_v54 = vld [vmem:[%s1366_s26 + $0x50] sm:$0xff] }
  0xb5   : > { %463 = vmatmul.f32.gmra.mxu1 %v311_v61 }
  0xbc   : > { %401 = vmatmul.f32.gmra.mxu0 %v312_v1 }
  0xbd   : > { %466 = vmatmul.f32.gmra.mxu1 %v313_v3  ;;  %v517_v3 = vld [vmem:[%s1366_s26 + $0x68] sm:$0xff] }
  0xc4   : > { %404 = vmatmul.f32.gmra.mxu0 %v314_v7 }
  0xc5   : > { %469 = vmatmul.f32.gmra.mxu1 %v315_v9  ;;  %v533_v9 = vmul.f32 0.1, %v517_v3 }
  0xcc   : > { %407 = vmatmul.f32.gmra.mxu0 %v316_v10 }
  0xcd   : > { %472 = vmatmul.f32.gmra.mxu1 %v317_v11 }
  0xf1   : > { %v375_v17 = vpop.f32.mrf.mxu0 }
  0xf2   : > { %v440_v18 = vpop.f32.mrf.mxu1 }
  0xf3   : > { %v441_v19 = vadd.f32 %v440_v18, %v375_v17 }
  0xf5   : > { %v488_v21 = vmul.f32 0.9, %v441_v19  ;;  %v511_v19 = vld [vmem:[%s1366_s26 + $0x38] sm:$0xff] }
  0xf7   : > { %v1445_v22 = vadd.f32 %v520_v20, %v488_v21 }
  0xf8   : > { %v411_v23 = vpop.f32.mrf.mxu3 }
  0xf9   : > { %584 = vmatmul.f32.vlgmr.msra.gmra.mxu2 %v1445_v22  ;;  %v378_v25 = vpop.f32.mrf.mxu0 }
  0xfa   : > { %v443_v26 = vpop.f32.mrf.mxu1 }
  0xfb   : > { %v444_v27 = vadd.f32 %v443_v26, %v378_v25 }
  0xfd   : > { %v489_v29 = vmul.f32 0.9, %v444_v27  ;;  %v527_v27 = vmul.f32 0.1, %v511_v19 }
  0xff   : > { %v1449_v30 = vadd.f32 %v521_v28, %v489_v29 }
 0x100   : > { %v414_v31 = vpop.f32.mrf.mxu3 }
 0x101   : > { %587 = vmatmul.f32.gmra.mxu2 %v1449_v30  ;;  %v381_v33 = vpop.f32.mrf.mxu0 }
 0x102   : > { %v446_v34 = vpop.f32.mrf.mxu1 }
 0x103   : > { %v447_v35 = vadd.f32 %v446_v34, %v381_v33  ;;  %v512_v34 = vld [vmem:[%s1366_s26 + $0x40] sm:$0xff] }
 0x105   : > { %v490_v37 = vmul.f32 0.9, %v447_v35 }
 0x107   : > { %v1453_v38 = vadd.f32 %v522_v36, %v490_v37 }
 0x108   : > { %v417_v39 = vpop.f32.mrf.mxu3 }
 0x109   : > { %590 = vmatmul.f32.gmra.mxu2 %v1453_v38  ;;  %v384_v41 = vpop.f32.mrf.mxu0 }
 0x10a   : > { %v449_v42 = vpop.f32.mrf.mxu1 }
 0x10b   : > { %v450_v43 = vadd.f32 %v449_v42, %v384_v41  ;;  %v528_v42 = vmul.f32 0.1, %v512_v34 }
 0x10d   : > { %v491_v45 = vmul.f32 0.9, %v450_v43 }
 0x10f   : > { %v1457_v46 = vadd.f32 %v523_v44, %v491_v45 }
 0x110   : > { %v420_v47 = vpop.f32.mrf.mxu3 }
 0x111   : > { %593 = vmatmul.f32.gmra.mxu2 %v1457_v46  ;;  %v387_v49 = vpop.f32.mrf.mxu0 }
 0x112   : > { %v452_v50 = vpop.f32.mrf.mxu1 }
 0x113   : > { %v453_v51 = vadd.f32 %v452_v50, %v387_v49 }
 0x115   : > { %v492_v53 = vmul.f32 0.9, %v453_v51  ;;  %v529_v51 = vmul.f32 0.1, %v513_v48 }
 0x117   : > { %v1462_v55 = vadd.f32 %v524_v52, %v492_v53 }
 0x118   : > { %v476_v56 = vpop.f32.mrf.mxu3 }
 0x119   : > { %v477_v58 = vadd.f32 %v476_v56, %v411_v23  ;;  %596 = vmatmul.f32.gmra.mxu2 %v1462_v55  ;;  %v390_v60 = vpop.f32.mrf.mxu0  ;;  %v534_v23 = vmul.f32 0.1, %v518_v16 }
 0x11a   : > { %v455_v61 = vpop.f32.mrf.mxu1 }
 0x11b   : > { %v500_v62 = vmul.f32 0.9, %v477_v58  ;;  %v456_v63 = vadd.f32 %v455_v61, %v390_v60 }
 0x11d   : > { %v1466_v1 = vadd.f32 %v532_v59, %v500_v62  ;;  %v493_v2 = vmul.f32 0.9, %v456_v63  ;;  %v530_v59 = vmul.f32 0.1, %v514_v54  ;;  %v515_v62 = vld [vmem:[%s1366_s26 + $0x58] sm:$0xff] }
 0x11e   : > { %v531_v3 = vmul.f32 0.1, %v515_v62 }
 0x11f   : > { %620 = vmatmul.f32.vlgmr.msra.gmra.mxu3 %v1466_v1  ;;  %v1470_v4 = vadd.f32 %v525_v0, %v493_v2 }
 0x120   : > { %v479_v5 = vpop.f32.mrf.mxu3 }
 0x121   : > { %v480_v7 = vadd.f32 %v479_v5, %v414_v31  ;;  %599 = vmatmul.f32.gmra.mxu2 %v1470_v4  ;;  %v393_v8 = vpop.f32.mrf.mxu0  ;;  %v519_v31 = vld [vmem:[%s1366_s26 + $0x78] sm:$0xff] }
 0x122   : > { %v458_v10 = vpop.f32.mrf.mxu1  ;;  %v535_v37 = vmul.f32 0.1, %v519_v31 }
 0x123   : > { %v501_v11 = vmul.f32 0.9, %v480_v7  ;;  %v459_v12 = vadd.f32 %v458_v10, %v393_v8  ;;  %v649_v8 = vmul.f32 0.5945349, %v1445_v22  ;;  %v651_v22 = vmul.f32 0.5945349, %v1453_v38 }
 0x124   : > { %v661_v38 = vmul.f32 0.5945349, %v1466_v1 }
 0x125   : > { %v494_v14 = vmul.f32 0.9, %v459_v12  ;;  %v1474_v15 = vadd.f32 %v533_v9, %v501_v11  ;;  %v650_v12 = vmul.f32 0.5945349, %v1449_v30  ;;  %v653_v30 = vmul.f32 0.5945349, %v1462_v55 }
 0x127   : > { %623 = vmatmul.f32.gmra.mxu3 %v1474_v15  ;;  %v1478_v17 = vadd.f32 %v526_v13, %v494_v14  ;;  %v662_v55 = vmul.f32 0.5945349, %v1474_v15 }
 0x128   : > { %v482_v18 = vpop.f32.mrf.mxu3 }
 0x129   : > { %v483_v20 = vadd.f32 %v482_v18, %v417_v39  ;;  %602 = vmatmul.f32.gmra.mxu2 %v1478_v17  ;;  %v396_v21 = vpop.f32.mrf.mxu0 }
 0x12a   : > { %v461_v24 = vpop.f32.mrf.mxu1 }
 0x12b   : > { %v502_v25 = vmul.f32 0.9, %v483_v20  ;;  %v462_v26 = vadd.f32 %v461_v24, %v396_v21  ;;  %v652_v21 = vmul.f32 0.5945349, %v1457_v46  ;;  %v654_v46 = vmul.f32 0.5945349, %v1470_v4 }
 0x12d   : > { %v495_v28 = vmul.f32 0.9, %v462_v26  ;;  %v1482_v29 = vadd.f32 %v534_v23, %v502_v25 }
 0x12f   : > { %626 = vmatmul.f32.gmra.mxu3 %v1482_v29  ;;  %v1486_v32 = vadd.f32 %v527_v27, %v495_v28  ;;  %v663_v48 = vmul.f32 0.5945349, %v1482_v29 }
 0x130   : > { %v485_v33 = vpop.f32.mrf.mxu3 }
 0x131   : > { %v486_v35 = vadd.f32 %v485_v33, %v420_v47  ;;  %605 = vmatmul.f32.gmra.mxu2 %v1486_v32  ;;  %v399_v36 = vpop.f32.mrf.mxu0  ;;  %v656_v15 = vmul.f32 0.5945349, %v1486_v32 }
 0x132   : > { %v464_v39 = vpop.f32.mrf.mxu1 }
 0x133   : > { %v503_v40 = vmul.f32 0.9, %v486_v35  ;;  %v465_v41 = vadd.f32 %v464_v39, %v399_v36 }
 0x135   : > { %v496_v43 = vmul.f32 0.9, %v465_v41  ;;  %v1490_v44 = vadd.f32 %v535_v37, %v503_v40  ;;  %v655_v41 = vmul.f32 0.5945349, %v1478_v17 }
 0x137   : > { %629 = vmatmul.f32.gmra.mxu3 %v1490_v44  ;;  %v1493_v45 = vadd.f32 %v528_v42, %v496_v43  ;;  %v664_v54 = vmul.f32 0.5945349, %v1490_v44 }
 0x139   : > { %608 = vmatmul.f32.gmra.mxu2 %v1493_v45  ;;  %v402_v47 = vpop.f32.mrf.mxu0  ;;  %v657_v29 = vmul.f32 0.5945349, %v1493_v45 }
 0x13a   : > { %v467_v49 = vpop.f32.mrf.mxu1 }
 0x13b   : > { %v468_v50 = vadd.f32 %v467_v49, %v402_v47 }
 0x13d   : > { %v497_v52 = vmul.f32 0.9, %v468_v50 }
 0x13f   : > { %v1497_v53 = vadd.f32 %v529_v51, %v497_v52 }
 0x141   : > { %611 = vmatmul.f32.gmra.mxu2 %v1497_v53  ;;  %v405_v56 = vpop.f32.mrf.mxu0  ;;  %v658_v62 = vmul.f32 0.5945349, %v1497_v53 }
 0x142   : > { %v470_v57 = vpop.f32.mrf.mxu1 }
 0x143   : > { %v471_v58 = vadd.f32 %v470_v57, %v405_v56 }
 0x145   : > { %v498_v60 = vmul.f32 0.9, %v471_v58 }
 0x147   : > { %v1501_v61 = vadd.f32 %v530_v59, %v498_v60 }
 0x149   : > { %614 = vmatmul.f32.gmra.mxu2 %v1501_v61  ;;  %v408_v63 = vpop.f32.mrf.mxu0 }
 0x14a   : > { %v473_v0 = vpop.f32.mrf.mxu1 }
 0x14b   : > { %v474_v2 = vadd.f32 %v473_v0, %v408_v63 }
 0x14d   : > { %v499_v5 = vmul.f32 0.9, %v474_v2  ;;  %v659_v2 = vmul.f32 0.5945349, %v1501_v61 }
 0x14f   : > { %v1505_v6 = vadd.f32 %v531_v3, %v499_v5 }
 0x151   : > { %617 = vmatmul.f32.gmra.mxu2 %v1505_v6  ;;  %v660_v5 = vmul.f32 0.5945349, %v1505_v6 }
 0x17c   : > { %v585_v7 = vpop.f32.mrf.mxu2 }
 0x17d   : > { %v633_v9 = vmul.f32 0.4054651, %v585_v7 }
 0x17f   : > { %v665_v10 = vadd.f32 %v649_v8, %v633_v9 }
 0x181   : > { %681 = vst [vmem:[%s1511_s21] sm:$0xff] %v665_v10 }
 0x184   : > { %v588_v11 = vpop.f32.mrf.mxu2 }
 0x185   : > { %v634_v13 = vmul.f32 0.4054651, %v588_v11 }
 0x187   : > { %v666_v14 = vadd.f32 %v650_v12, %v634_v13 }
 0x189   : > { %682 = vst [vmem:[%s1511_s21 + $0x8] sm:$0xff] %v666_v14 }
 0x18c   : > { %v591_v16 = vpop.f32.mrf.mxu2 }
 0x18d   : > { %v635_v18 = vmul.f32 0.4054651, %v591_v16 }
 0x18f   : > { %v667_v19 = vadd.f32 %v651_v22, %v635_v18 }
 0x191   : > { %683 = vst [vmem:[%s1511_s21 + $0x10] sm:$0xff] %v667_v19 }
 0x194   : > { %v594_v20 = vpop.f32.mrf.mxu2 }
 0x195   : > { %v636_v23 = vmul.f32 0.4054651, %v594_v20 }
 0x197   : > { %v668_v24 = vadd.f32 %v652_v21, %v636_v23 }
 0x199   : > { %684 = vst [vmem:[%s1511_s21 + $0x18] sm:$0xff] %v668_v24 }
 0x19c   : > { %v597_v25 = vpop.f32.mrf.mxu2 }
 0x19d   : > { %v637_v26 = vmul.f32 0.4054651, %v597_v25 }
 0x19f   : > { %v669_v27 = vadd.f32 %v653_v30, %v637_v26 }
 0x1a1   : > { %685 = vst [vmem:[%s1511_s21 + $0x20] sm:$0xff] %v669_v27 }
 0x1a2   : > { %v621_v28 = vpop.f32.mrf.mxu3 }
 0x1a3   : > { %v645_v31 = vmul.f32 0.4054651, %v621_v28 }
 0x1a4   : > { %v600_v33 = vpop.f32.mrf.mxu2 }
 0x1a5   : > { %v677_v34 = vadd.f32 %v661_v38, %v645_v31  ;;  %v638_v35 = vmul.f32 0.4054651, %v600_v33 }
 0x1a7   : > { %693 = vst [vmem:[%s1511_s21 + $0x60] sm:$0xff] %v677_v34  ;;  %v670_v36 = vadd.f32 %v654_v46, %v638_v35 }
 0x1a9   : > { %686 = vst [vmem:[%s1511_s21 + $0x28] sm:$0xff] %v670_v36 }
 0x1aa   : > { %v624_v37 = vpop.f32.mrf.mxu3 }
 0x1ab   : > { %v646_v39 = vmul.f32 0.4054651, %v624_v37 }
 0x1ac   : > { %v603_v40 = vpop.f32.mrf.mxu2 }
 0x1ad   : > { %v678_v42 = vadd.f32 %v662_v55, %v646_v39  ;;  %v639_v1 = vmul.f32 0.4054651, %v603_v40 }
 0x1af   : > { %694 = vst [vmem:[%s1511_s21 + $0x68] sm:$0xff] %v678_v42  ;;  %v671_v43 = vadd.f32 %v655_v41, %v639_v1 }
 0x1b1   : > { %687 = vst [vmem:[%s1511_s21 + $0x30] sm:$0xff] %v671_v43 }
 0x1b2   : > { %v627_v4 = vpop.f32.mrf.mxu3 }
 0x1b3   : > { %v647_v47 = vmul.f32 0.4054651, %v627_v4 }
 0x1b4   : > { %v606_v49 = vpop.f32.mrf.mxu2 }
 0x1b5   : > { %v679_v50 = vadd.f32 %v663_v48, %v647_v47  ;;  %v640_v51 = vmul.f32 0.4054651, %v606_v49 }
 0x1b7   : > { %695 = vst [vmem:[%s1511_s21 + $0x70] sm:$0xff] %v679_v50  ;;  %v672_v52 = vadd.f32 %v656_v15, %v640_v51 }
 0x1b9   : > { %688 = vst [vmem:[%s1511_s21 + $0x38] sm:$0xff] %v672_v52 }
 0x1ba   : > { %v630_v17 = vpop.f32.mrf.mxu3 }
 0x1bb   : > { %v648_v56 = vmul.f32 0.4054651, %v630_v17 }
 0x1bc   : > { %v609_v57 = vpop.f32.mrf.mxu2 }
 0x1bd   : > { %v680_v58 = vadd.f32 %v664_v54, %v648_v56  ;;  %v641_v59 = vmul.f32 0.4054651, %v609_v57 }
 0x1bf   : > { %696 = vst [vmem:[%s1511_s21 + $0x78] sm:$0xff] %v680_v58  ;;  %v673_v32 = vadd.f32 %v657_v29, %v641_v59 }
 0x1c1   : > { %689 = vst [vmem:[%s1511_s21 + $0x40] sm:$0xff] %v673_v32 }
 0x1c4   : > { %v612_v60 = vpop.f32.mrf.mxu2 }
 0x1c5   : > { %v642_v63 = vmul.f32 0.4054651, %v612_v60 }
 0x1c7   : > { %v674_v0 = vadd.f32 %v658_v62, %v642_v63 }
 0x1c9   : > { %690 = vst [vmem:[%s1511_s21 + $0x48] sm:$0xff] %v674_v0 }
 0x1cc   : > { %v615_v44 = vpop.f32.mrf.mxu2 }
 0x1cd   : > { %v643_v3 = vmul.f32 0.4054651, %v615_v44 }
 0x1cf   : > { %v675_v45 = vadd.f32 %v659_v2, %v643_v3 }
 0x1d1   : > { %691 = vst [vmem:[%s1511_s21 + $0x50] sm:$0xff] %v675_v45 }
 0x1d4   : > { %v618_v53 = vpop.f32.mrf.mxu2 }
 0x1d5   : > { %v644_v7 = vmul.f32 0.4054651, %v618_v53 }
 0x1d7   : > { %v676_v8 = vadd.f32 %v660_v5, %v644_v7 }
 0x1d9   : > { %692 = vst [vmem:[%s1511_s21 + $0x58] sm:$0xff] %v676_v8 }
 0x1da   : > { %1125 = shalt.err (!%p1122_p10)
}
 0x1db   : > { %s1184_s17 = smov 128   ;;  %s1185_s29 = smov 8  }
 0x1dc   : > { %912 = dma.vmem_to_hbm [thread:$0]  (%p1287_p7), %s711_s6, 2048, %s713_s20, %s698_s24, %s1184_s17, %s1184_s17, %s1185_s29  }
 0x1dd PF: > { %s727_s25 = sand.u32 1, %s1164_s15   ;;  %p1613_p3 = scmp.ge.s32.totalorder %s1176_s18, 2 }
 0x1de   : > { %s728_s13 = scalar_lea.sflag [#allocation4], %s727_s25 }
 0x1df   : > { %p929_p9 = pnand %p1613_p3, %p1246_p6 }
 0x1e1   : > { %p930_p8 = pneg %p929_p9 }
 0x1e3   : > { %1159 = dma.done.wait (%p930_p8), %s728_s13, 2048  }
 0x1e4   : > { %1161 = vsyncadd (%p930_p8), %s728_s13, 4294965248  ;;  %s1614_s18 = sld [smem:[#allocation17_spill]]  ;;  %s1617_s15 = smov %s1168_s16 }
 0x1e5   : > { %s1615_s14 = sld [smem:[#allocation15_spill]] }
 0x1e6   : > { %s1616_s17 = sld [smem:[#allocation18_spill]] }
 0x1ea   : > { %p18_p12 = scmp.ge.s32.totalorder %s1614_s18, 4  }
 0x1eb   : > { %s1618_s16 = smov %s1615_s14 }
 0x1ec   :  { %20 = sbr.rel (!%p18_p12) target bundleno = 9 (0x9), region = 100 }
 0x1f1   :  { %734 = vsyncpa [#allocation3], 1 }
 0x1f2   :  { %736 = vsyncpa [#allocation3 + $0x1], 1 }
 0x1f3   :  { %737 = vsyncpa [#allocation6], 1 }
 0x1f4   :  { %738 = vsyncpa [#allocation4], 1 }
 0x1f5   :  { %740 = vsyncpa [#allocation4 + $0x1], 1 }

</bundles_post_ra>
